<compile_context>
chip_gen: v6e
topology: v6e:2x2x1
jax: 0.10.0
libtpu: 0.0.40
codegen_flags: <defaults>
</compile_context>

<pallas_src>
import functools

import jax
import jax.numpy as jnp
from jax.experimental import pallas as pl


# ----------------------------------------------------------------------------
# Fused kernel: 3 GRU recurrences + classifier, single invocation (no grid).
# ----------------------------------------------------------------------------
def _fused_fund_gru_kernel(
    xd_ref, xw_ref, xm_ref,
    wih_d_ref, whh_d_ref, bih_d_ref, bhh_d_ref,
    wih_w_ref, whh_w_ref, bih_w_ref, bhh_w_ref,
    wih_m_ref, whh_m_ref, bih_m_ref, bhh_m_ref,
    w1d_ref, w1w_ref, w1m_ref, b1_ref, w2_ref, b2_ref,
    out_ref,
    *, hidden_size, batch_pad, t_daily, t_weekly, t_monthly):
  H = hidden_size
  Bp = batch_pad

  def gru_last_hidden(x_ref, wih_ref, whh_ref, bih_ref, bhh_ref, T):
    # x_ref: (T * Bp, I), time-major.  One batched matmul for every timestep's
    # input projection (gates packed as [r | z | n] along lanes).
    gi_all = (jnp.dot(x_ref[...], wih_ref[...],
                      preferred_element_type=jnp.float32) + bih_ref[...])
    w_hh = whh_ref[...]                                     # (H, 3H)
    b_hh = jnp.broadcast_to(bhh_ref[...], (Bp, 3 * H))      # hoisted broadcast
    h = jnp.zeros((Bp, H), jnp.float32)
    # Fully unrolled recurrence; T is a small static trace-time constant, so
    # all slices below are static and sublane-tile aligned (Bp % 8 == 0).
    for t in range(T):
      gi = gi_all[t * Bp:(t + 1) * Bp, :]                   # (Bp, 3H)
      gh = jnp.dot(h, w_hh, preferred_element_type=jnp.float32) + b_hh
      r = jax.nn.sigmoid(gi[:, 0:H] + gh[:, 0:H])
      z = jax.nn.sigmoid(gi[:, H:2 * H] + gh[:, H:2 * H])
      n = jnp.tanh(gi[:, 2 * H:3 * H] + r * gh[:, 2 * H:3 * H])
      h = (1.0 - z) * n + z * h
    return h

  h_d = gru_last_hidden(xd_ref, wih_d_ref, whh_d_ref, bih_d_ref, bhh_d_ref,
                        t_daily)
  h_w = gru_last_hidden(xw_ref, wih_w_ref, whh_w_ref, bih_w_ref, bhh_w_ref,
                        t_weekly)
  h_m = gru_last_hidden(xm_ref, wih_m_ref, whh_m_ref, bih_m_ref, bhh_m_ref,
                        t_monthly)

  # Classifier: Linear(3H -> H) with the feature concat folded into three
  # partial matmuls (mathematically identical to concat @ W1^T).
  z1 = (jnp.dot(h_d, w1d_ref[...], preferred_element_type=jnp.float32)
        + jnp.dot(h_w, w1w_ref[...], preferred_element_type=jnp.float32)
        + jnp.dot(h_m, w1m_ref[...], preferred_element_type=jnp.float32)
        + b1_ref[...])
  a1 = jnp.maximum(z1, 0.0)                                 # ReLU
  # Dropout(p=0.5) == identity at inference.
  # Linear(H -> 1) as a VPU lane reduction (avoids a degenerate N=1 MXU pass).
  logit = jnp.sum(a1 * w2_ref[...], axis=-1, keepdims=True) + b2_ref[...]
  # Lane-dense store; wrapper slices column 0.
  out_ref[...] = jnp.broadcast_to(logit, out_ref.shape).astype(out_ref.dtype)


# ----------------------------------------------------------------------------
# Wrapper: pad batch to sublane multiple, time-major 2-D inputs, one call.
# ----------------------------------------------------------------------------
def fund_gru_forward(kparams, daily_input, weekly_input, monthly_input):
  B, t_d, I = daily_input.shape
  t_w = weekly_input.shape[1]
  t_m = monthly_input.shape[1]
  H = kparams["classifier"][3].shape[-1]          # b1 has shape (1, H)
  Bp = ((B + 7) // 8) * 8                         # pad batch to 8-sublane mult

  def prep(x):
    T = x.shape[1]
    x = x.astype(jnp.float32)
    x = jnp.pad(x, ((0, Bp - B), (0, 0), (0, 0)))
    # time-major 2-D layout: row index = t * Bp + b
    return jnp.transpose(x, (1, 0, 2)).reshape(T * Bp, I)

  xd, xw, xm = prep(daily_input), prep(weekly_input), prep(monthly_input)

  kernel = functools.partial(
      _fused_fund_gru_kernel, hidden_size=H, batch_pad=Bp,
      t_daily=t_d, t_weekly=t_w, t_monthly=t_m)

  out_slab = pl.pallas_call(
      kernel,
      out_shape=jax.ShapeDtypeStruct((Bp, 128), jnp.float32),
  )(xd, xw, xm,
    *kparams["daily"], *kparams["weekly"], *kparams["monthly"],
    *kparams["classifier"])
  return out_slab[:B, 0:1]                        # (B, 1) logits


# ----------------------------------------------------------------------------
# Parameters: PyTorch-layout init + one-time conversion to kernel layout.
# ----------------------------------------------------------------------------
def init_torch_style_params(key, input_size, hidden_size):
  """Deterministic init mirroring nn.GRU / nn.Linear parameter shapes."""
  H, I = hidden_size, input_size
  bound = 1.0 / jnp.sqrt(jnp.float32(H))

  def uni(k, shape):
    return jax.random.uniform(k, shape, jnp.float32, -bound, bound)

  keys = jax.random.split(key, 16)
  params = {}
  for idx, name in enumerate(("daily", "weekly", "monthly")):
    k0, k1, k2, k3 = keys[4 * idx:4 * idx + 4]
    params[name] = (
        uni(k0, (3 * H, I)),      # weight_ih_l0
        uni(k1, (3 * H, H)),      # weight_hh_l0
        uni(k2, (3 * H,)),        # bias_ih_l0
        uni(k3, (3 * H,)),        # bias_hh_l0
    )
  kc0, kc1, kc2, kc3 = keys[12:16]
  params["classifier"] = (
      uni(kc0, (H, 3 * H)),       # Linear(3H -> H) weight
      uni(kc1, (H,)),             # bias
      uni(kc2, (1, H)),           # Linear(H -> 1) weight
      uni(kc3, (1,)),             # bias
  )
  return params


def prepare_kernel_params(params):
  """One-time layout conversion (transposes / reshapes hoisted out of fwd)."""
  kp = {}
  for name in ("daily", "weekly", "monthly"):
    w_ih, w_hh, b_ih, b_hh = params[name]
    kp[name] = (
        jnp.transpose(w_ih),            # (I, 3H)
        jnp.transpose(w_hh),            # (H, 3H)
        b_ih.reshape(1, -1),            # (1, 3H)
        b_hh.reshape(1, -1),            # (1, 3H)
    )
  w1, b1, w2, b2 = params["classifier"]
  H = w1.shape[0]
  w1_t = jnp.transpose(w1)              # (3H, H)
  kp["classifier"] = (
      w1_t[0:H],                        # (H, H) daily slice of W1^T
      w1_t[H:2 * H],                    # (H, H) weekly slice
      w1_t[2 * H:3 * H],                # (H, H) monthly slice
      b1.reshape(1, H),
      w2.reshape(1, H),                 # row vector for VPU reduction
      b2.reshape(1, 1),
  )
  return kp


# ----------------------------------------------------------------------------
# Pure-JAX reference (mirrors PyTorch nn.GRU / classifier exactly).
# ----------------------------------------------------------------------------
def _gru_last_hidden_ref(x, w_ih, w_hh, b_ih, b_hh):
  B, T, _ = x.shape
  H = w_hh.shape[1]
  h = jnp.zeros((B, H), jnp.float32)
  for t in range(T):
    gi = x[:, t, :] @ w_ih.T + b_ih
    gh = h @ w_hh.T + b_hh
    r = jax.nn.sigmoid(gi[:, 0:H] + gh[:, 0:H])
    z = jax.nn.sigmoid(gi[:, H:2 * H] + gh[:, H:2 * H])
    n = jnp.tanh(gi[:, 2 * H:3 * H] + r * gh[:, 2 * H:3 * H])
    h = (1.0 - z) * n + z * h
  return h


def fund_gru_ref(params, daily, weekly, monthly):
  h_d = _gru_last_hidden_ref(daily, *params["daily"])
  h_w = _gru_last_hidden_ref(weekly, *params["weekly"])
  h_m = _gru_last_hidden_ref(monthly, *params["monthly"])
  merged = jnp.concatenate([h_d, h_w, h_m], axis=1)
  w1, b1, w2, b2 = params["classifier"]
  a1 = jnp.maximum(merged @ w1.T + b1, 0.0)
  return a1 @ w2.T + b2


if __name__ == "__main__":
  input_size = 8
  hidden_size = 32
  batch = 2
  t_daily, t_weekly, t_monthly = 8, 4, 3

  key = jax.random.PRNGKey(0)
  k_param, k_d, k_w, k_m = jax.random.split(key, 4)

  params = init_torch_style_params(k_param, input_size, hidden_size)
  kparams = prepare_kernel_params(params)

  daily = jax.random.normal(k_d, (batch, t_daily, input_size), jnp.float32)
  weekly = jax.random.normal(k_w, (batch, t_weekly, input_size), jnp.float32)
  monthly = jax.random.normal(k_m, (batch, t_monthly, input_size), jnp.float32)

  forward = jax.jit(fund_gru_forward)
  logits = forward(kparams, daily, weekly, monthly)
  jax.block_until_ready(logits)
  assert logits.shape == (batch, 1)

  ref = fund_gru_ref(params, daily, weekly, monthly)
  assert jnp.allclose(logits, ref, rtol=1e-3, atol=1e-4), (logits, ref)

  print("KERNEL_OK")
</pallas_src>

<mosaic_0001>
module attributes {stable_mosaic.version = 11 : i64} {
  func.func @_fused_fund_gru_kernel(%arg0: memref<64x8xf32, #tpu.memory_space<vmem>>, %arg1: memref<32x8xf32, #tpu.memory_space<vmem>>, %arg2: memref<24x8xf32, #tpu.memory_space<vmem>>, %arg3: memref<8x96xf32, #tpu.memory_space<vmem>>, %arg4: memref<32x96xf32, #tpu.memory_space<vmem>>, %arg5: memref<1x96xf32, #tpu.memory_space<vmem>>, %arg6: memref<1x96xf32, #tpu.memory_space<vmem>>, %arg7: memref<8x96xf32, #tpu.memory_space<vmem>>, %arg8: memref<32x96xf32, #tpu.memory_space<vmem>>, %arg9: memref<1x96xf32, #tpu.memory_space<vmem>>, %arg10: memref<1x96xf32, #tpu.memory_space<vmem>>, %arg11: memref<8x96xf32, #tpu.memory_space<vmem>>, %arg12: memref<32x96xf32, #tpu.memory_space<vmem>>, %arg13: memref<1x96xf32, #tpu.memory_space<vmem>>, %arg14: memref<1x96xf32, #tpu.memory_space<vmem>>, %arg15: memref<32x32xf32, #tpu.memory_space<vmem>>, %arg16: memref<32x32xf32, #tpu.memory_space<vmem>>, %arg17: memref<32x32xf32, #tpu.memory_space<vmem>>, %arg18: memref<1x32xf32, #tpu.memory_space<vmem>>, %arg19: memref<1x32xf32, #tpu.memory_space<vmem>>, %arg20: memref<1x1xf32, #tpu.memory_space<vmem>>, %arg21: memref<8x128xf32, #tpu.memory_space<vmem>>) attributes {dimension_semantics = [], scalar_prefetch = 0 : i64, scratch_operands = 0 : i64, tpu.core_type = #tpu.core_type<tc>} {
    %c0 = arith.constant 0 : index
    %c0_0 = arith.constant 0 : index
    %0 = vector.load %arg0[%c0, %c0_0] : memref<64x8xf32, #tpu.memory_space<vmem>>, vector<64x8xf32>
    %c0_1 = arith.constant 0 : index
    %c0_2 = arith.constant 0 : index
    %1 = vector.load %arg3[%c0_1, %c0_2] : memref<8x96xf32, #tpu.memory_space<vmem>>, vector<8x96xf32>
    %cst = arith.constant dense<0.000000e+00> : vector<64x96xf32>
    %2 = tpu.matmul %0, %1, %cst {dimension_numbers = #tpu.dot_dimension_numbers<[1], [0], [0], [1], [0, 0, 1, 1], [], []>} : vector<64x8xf32>, vector<8x96xf32>, vector<64x96xf32> -> vector<64x96xf32>
    %c0_3 = arith.constant 0 : index
    %c0_4 = arith.constant 0 : index
    %3 = vector.load %arg5[%c0_3, %c0_4] : memref<1x96xf32, #tpu.memory_space<vmem>>, vector<1x96xf32>
    %4 = vector.broadcast %3 : vector<1x96xf32> to vector<64x96xf32>
    %5 = arith.addf %2, %4 : vector<64x96xf32>
    %c0_5 = arith.constant 0 : index
    %c0_6 = arith.constant 0 : index
    %6 = vector.load %arg4[%c0_5, %c0_6] : memref<32x96xf32, #tpu.memory_space<vmem>>, vector<32x96xf32>
    %c0_7 = arith.constant 0 : index
    %c0_8 = arith.constant 0 : index
    %7 = vector.load %arg6[%c0_7, %c0_8] : memref<1x96xf32, #tpu.memory_space<vmem>>, vector<1x96xf32>
    %8 = vector.shape_cast %7 : vector<1x96xf32> to vector<1x96xf32>
    %9 = vector.broadcast %8 : vector<1x96xf32> to vector<8x96xf32>
    %cst_9 = arith.constant 0.000000e+00 : f32
    %10 = vector.broadcast %cst_9 : f32 to vector<8x32xf32>
    %11 = vector.extract_strided_slice %5 {offsets = [0, 0], sizes = [8, 96], strides = [1, 1]} : vector<64x96xf32> to vector<8x96xf32>
    %cst_10 = arith.constant dense<0.000000e+00> : vector<8x96xf32>
    %12 = tpu.matmul %10, %6, %cst_10 {dimension_numbers = #tpu.dot_dimension_numbers<[1], [0], [0], [1], [0, 0, 1, 1], [], []>} : vector<8x32xf32>, vector<32x96xf32>, vector<8x96xf32> -> vector<8x96xf32>
    %13 = arith.addf %12, %9 : vector<8x96xf32>
    %14 = vector.extract_strided_slice %11 {offsets = [0, 0], sizes = [8, 32], strides = [1, 1]} : vector<8x96xf32> to vector<8x32xf32>
    %15 = vector.extract_strided_slice %13 {offsets = [0, 0], sizes = [8, 32], strides = [1, 1]} : vector<8x96xf32> to vector<8x32xf32>
    %16 = arith.addf %14, %15 : vector<8x32xf32>
    %17 = arith.negf %16 : vector<8x32xf32>
    %18 = math.exp %17 : vector<8x32xf32>
    %cst_11 = arith.constant 1.000000e+00 : f32
    %19 = vector.broadcast %cst_11 : f32 to vector<8x32xf32>
    %20 = arith.addf %19, %18 : vector<8x32xf32>
    %21 = arith.divf %19, %20 : vector<8x32xf32>
    %22 = vector.extract_strided_slice %11 {offsets = [0, 32], sizes = [8, 32], strides = [1, 1]} : vector<8x96xf32> to vector<8x32xf32>
    %23 = vector.extract_strided_slice %13 {offsets = [0, 32], sizes = [8, 32], strides = [1, 1]} : vector<8x96xf32> to vector<8x32xf32>
    %24 = arith.addf %22, %23 : vector<8x32xf32>
    %25 = arith.negf %24 : vector<8x32xf32>
    %26 = math.exp %25 : vector<8x32xf32>
    %cst_12 = arith.constant 1.000000e+00 : f32
    %27 = vector.broadcast %cst_12 : f32 to vector<8x32xf32>
    %28 = arith.addf %27, %26 : vector<8x32xf32>
    %29 = arith.divf %27, %28 : vector<8x32xf32>
    %30 = vector.extract_strided_slice %11 {offsets = [0, 64], sizes = [8, 32], strides = [1, 1]} : vector<8x96xf32> to vector<8x32xf32>
    %31 = vector.extract_strided_slice %13 {offsets = [0, 64], sizes = [8, 32], strides = [1, 1]} : vector<8x96xf32> to vector<8x32xf32>
    %32 = arith.mulf %21, %31 : vector<8x32xf32>
    %33 = arith.addf %30, %32 : vector<8x32xf32>
    %34 = math.tanh %33 : vector<8x32xf32>
    %cst_13 = arith.constant 1.000000e+00 : f32
    %35 = vector.broadcast %cst_13 : f32 to vector<8x32xf32>
    %36 = arith.subf %35, %29 : vector<8x32xf32>
    %37 = arith.mulf %36, %34 : vector<8x32xf32>
    %38 = arith.mulf %29, %10 : vector<8x32xf32>
    %39 = arith.addf %37, %38 : vector<8x32xf32>
    %40 = vector.extract_strided_slice %5 {offsets = [8, 0], sizes = [8, 96], strides = [1, 1]} : vector<64x96xf32> to vector<8x96xf32>
    %cst_14 = arith.constant dense<0.000000e+00> : vector<8x96xf32>
    %41 = tpu.matmul %39, %6, %cst_14 {dimension_numbers = #tpu.dot_dimension_numbers<[1], [0], [0], [1], [0, 0, 1, 1], [], []>} : vector<8x32xf32>, vector<32x96xf32>, vector<8x96xf32> -> vector<8x96xf32>
    %42 = arith.addf %41, %9 : vector<8x96xf32>
    %43 = vector.extract_strided_slice %40 {offsets = [0, 0], sizes = [8, 32], strides = [1, 1]} : vector<8x96xf32> to vector<8x32xf32>
    %44 = vector.extract_strided_slice %42 {offsets = [0, 0], sizes = [8, 32], strides = [1, 1]} : vector<8x96xf32> to vector<8x32xf32>
    %45 = arith.addf %43, %44 : vector<8x32xf32>
    %46 = arith.negf %45 : vector<8x32xf32>
    %47 = math.exp %46 : vector<8x32xf32>
    %cst_15 = arith.constant 1.000000e+00 : f32
    %48 = vector.broadcast %cst_15 : f32 to vector<8x32xf32>
    %49 = arith.addf %48, %47 : vector<8x32xf32>
    %50 = arith.divf %48, %49 : vector<8x32xf32>
    %51 = vector.extract_strided_slice %40 {offsets = [0, 32], sizes = [8, 32], strides = [1, 1]} : vector<8x96xf32> to vector<8x32xf32>
    %52 = vector.extract_strided_slice %42 {offsets = [0, 32], sizes = [8, 32], strides = [1, 1]} : vector<8x96xf32> to vector<8x32xf32>
    %53 = arith.addf %51, %52 : vector<8x32xf32>
    %54 = arith.negf %53 : vector<8x32xf32>
    %55 = math.exp %54 : vector<8x32xf32>
    %cst_16 = arith.constant 1.000000e+00 : f32
    %56 = vector.broadcast %cst_16 : f32 to vector<8x32xf32>
    %57 = arith.addf %56, %55 : vector<8x32xf32>
    %58 = arith.divf %56, %57 : vector<8x32xf32>
    %59 = vector.extract_strided_slice %40 {offsets = [0, 64], sizes = [8, 32], strides = [1, 1]} : vector<8x96xf32> to vector<8x32xf32>
    %60 = vector.extract_strided_slice %42 {offsets = [0, 64], sizes = [8, 32], strides = [1, 1]} : vector<8x96xf32> to vector<8x32xf32>
    %61 = arith.mulf %50, %60 : vector<8x32xf32>
    %62 = arith.addf %59, %61 : vector<8x32xf32>
    %63 = math.tanh %62 : vector<8x32xf32>
    %cst_17 = arith.constant 1.000000e+00 : f32
    %64 = vector.broadcast %cst_17 : f32 to vector<8x32xf32>
    %65 = arith.subf %64, %58 : vector<8x32xf32>
    %66 = arith.mulf %65, %63 : vector<8x32xf32>
    %67 = arith.mulf %58, %39 : vector<8x32xf32>
    %68 = arith.addf %66, %67 : vector<8x32xf32>
    %69 = vector.extract_strided_slice %5 {offsets = [16, 0], sizes = [8, 96], strides = [1, 1]} : vector<64x96xf32> to vector<8x96xf32>
    %cst_18 = arith.constant dense<0.000000e+00> : vector<8x96xf32>
    %70 = tpu.matmul %68, %6, %cst_18 {dimension_numbers = #tpu.dot_dimension_numbers<[1], [0], [0], [1], [0, 0, 1, 1], [], []>} : vector<8x32xf32>, vector<32x96xf32>, vector<8x96xf32> -> vector<8x96xf32>
    %71 = arith.addf %70, %9 : vector<8x96xf32>
    %72 = vector.extract_strided_slice %69 {offsets = [0, 0], sizes = [8, 32], strides = [1, 1]} : vector<8x96xf32> to vector<8x32xf32>
    %73 = vector.extract_strided_slice %71 {offsets = [0, 0], sizes = [8, 32], strides = [1, 1]} : vector<8x96xf32> to vector<8x32xf32>
    %74 = arith.addf %72, %73 : vector<8x32xf32>
    %75 = arith.negf %74 : vector<8x32xf32>
    %76 = math.exp %75 : vector<8x32xf32>
    %cst_19 = arith.constant 1.000000e+00 : f32
    %77 = vector.broadcast %cst_19 : f32 to vector<8x32xf32>
    %78 = arith.addf %77, %76 : vector<8x32xf32>
    %79 = arith.divf %77, %78 : vector<8x32xf32>
    %80 = vector.extract_strided_slice %69 {offsets = [0, 32], sizes = [8, 32], strides = [1, 1]} : vector<8x96xf32> to vector<8x32xf32>
    %81 = vector.extract_strided_slice %71 {offsets = [0, 32], sizes = [8, 32], strides = [1, 1]} : vector<8x96xf32> to vector<8x32xf32>
    %82 = arith.addf %80, %81 : vector<8x32xf32>
    %83 = arith.negf %82 : vector<8x32xf32>
    %84 = math.exp %83 : vector<8x32xf32>
    %cst_20 = arith.constant 1.000000e+00 : f32
    %85 = vector.broadcast %cst_20 : f32 to vector<8x32xf32>
    %86 = arith.addf %85, %84 : vector<8x32xf32>
    %87 = arith.divf %85, %86 : vector<8x32xf32>
    %88 = vector.extract_strided_slice %69 {offsets = [0, 64], sizes = [8, 32], strides = [1, 1]} : vector<8x96xf32> to vector<8x32xf32>
    %89 = vector.extract_strided_slice %71 {offsets = [0, 64], sizes = [8, 32], strides = [1, 1]} : vector<8x96xf32> to vector<8x32xf32>
    %90 = arith.mulf %79, %89 : vector<8x32xf32>
    %91 = arith.addf %88, %90 : vector<8x32xf32>
    %92 = math.tanh %91 : vector<8x32xf32>
    %cst_21 = arith.constant 1.000000e+00 : f32
    %93 = vector.broadcast %cst_21 : f32 to vector<8x32xf32>
    %94 = arith.subf %93, %87 : vector<8x32xf32>
    %95 = arith.mulf %94, %92 : vector<8x32xf32>
    %96 = arith.mulf %87, %68 : vector<8x32xf32>
    %97 = arith.addf %95, %96 : vector<8x32xf32>
    %98 = vector.extract_strided_slice %5 {offsets = [24, 0], sizes = [8, 96], strides = [1, 1]} : vector<64x96xf32> to vector<8x96xf32>
    %cst_22 = arith.constant dense<0.000000e+00> : vector<8x96xf32>
    %99 = tpu.matmul %97, %6, %cst_22 {dimension_numbers = #tpu.dot_dimension_numbers<[1], [0], [0], [1], [0, 0, 1, 1], [], []>} : vector<8x32xf32>, vector<32x96xf32>, vector<8x96xf32> -> vector<8x96xf32>
    %100 = arith.addf %99, %9 : vector<8x96xf32>
    %101 = vector.extract_strided_slice %98 {offsets = [0, 0], sizes = [8, 32], strides = [1, 1]} : vector<8x96xf32> to vector<8x32xf32>
    %102 = vector.extract_strided_slice %100 {offsets = [0, 0], sizes = [8, 32], strides = [1, 1]} : vector<8x96xf32> to vector<8x32xf32>
    %103 = arith.addf %101, %102 : vector<8x32xf32>
    %104 = arith.negf %103 : vector<8x32xf32>
    %105 = math.exp %104 : vector<8x32xf32>
    %cst_23 = arith.constant 1.000000e+00 : f32
    %106 = vector.broadcast %cst_23 : f32 to vector<8x32xf32>
    %107 = arith.addf %106, %105 : vector<8x32xf32>
    %108 = arith.divf %106, %107 : vector<8x32xf32>
    %109 = vector.extract_strided_slice %98 {offsets = [0, 32], sizes = [8, 32], strides = [1, 1]} : vector<8x96xf32> to vector<8x32xf32>
    %110 = vector.extract_strided_slice %100 {offsets = [0, 32], sizes = [8, 32], strides = [1, 1]} : vector<8x96xf32> to vector<8x32xf32>
    %111 = arith.addf %109, %110 : vector<8x32xf32>
    %112 = arith.negf %111 : vector<8x32xf32>
    %113 = math.exp %112 : vector<8x32xf32>
    %cst_24 = arith.constant 1.000000e+00 : f32
    %114 = vector.broadcast %cst_24 : f32 to vector<8x32xf32>
    %115 = arith.addf %114, %113 : vector<8x32xf32>
    %116 = arith.divf %114, %115 : vector<8x32xf32>
    %117 = vector.extract_strided_slice %98 {offsets = [0, 64], sizes = [8, 32], strides = [1, 1]} : vector<8x96xf32> to vector<8x32xf32>
    %118 = vector.extract_strided_slice %100 {offsets = [0, 64], sizes = [8, 32], strides = [1, 1]} : vector<8x96xf32> to vector<8x32xf32>
    %119 = arith.mulf %108, %118 : vector<8x32xf32>
    %120 = arith.addf %117, %119 : vector<8x32xf32>
    %121 = math.tanh %120 : vector<8x32xf32>
    %cst_25 = arith.constant 1.000000e+00 : f32
    %122 = vector.broadcast %cst_25 : f32 to vector<8x32xf32>
    %123 = arith.subf %122, %116 : vector<8x32xf32>
    %124 = arith.mulf %123, %121 : vector<8x32xf32>
    %125 = arith.mulf %116, %97 : vector<8x32xf32>
    %126 = arith.addf %124, %125 : vector<8x32xf32>
    %127 = vector.extract_strided_slice %5 {offsets = [32, 0], sizes = [8, 96], strides = [1, 1]} : vector<64x96xf32> to vector<8x96xf32>
    %cst_26 = arith.constant dense<0.000000e+00> : vector<8x96xf32>
    %128 = tpu.matmul %126, %6, %cst_26 {dimension_numbers = #tpu.dot_dimension_numbers<[1], [0], [0], [1], [0, 0, 1, 1], [], []>} : vector<8x32xf32>, vector<32x96xf32>, vector<8x96xf32> -> vector<8x96xf32>
    %129 = arith.addf %128, %9 : vector<8x96xf32>
    %130 = vector.extract_strided_slice %127 {offsets = [0, 0], sizes = [8, 32], strides = [1, 1]} : vector<8x96xf32> to vector<8x32xf32>
    %131 = vector.extract_strided_slice %129 {offsets = [0, 0], sizes = [8, 32], strides = [1, 1]} : vector<8x96xf32> to vector<8x32xf32>
    %132 = arith.addf %130, %131 : vector<8x32xf32>
    %133 = arith.negf %132 : vector<8x32xf32>
    %134 = math.exp %133 : vector<8x32xf32>
    %cst_27 = arith.constant 1.000000e+00 : f32
    %135 = vector.broadcast %cst_27 : f32 to vector<8x32xf32>
    %136 = arith.addf %135, %134 : vector<8x32xf32>
    %137 = arith.divf %135, %136 : vector<8x32xf32>
    %138 = vector.extract_strided_slice %127 {offsets = [0, 32], sizes = [8, 32], strides = [1, 1]} : vector<8x96xf32> to vector<8x32xf32>
    %139 = vector.extract_strided_slice %129 {offsets = [0, 32], sizes = [8, 32], strides = [1, 1]} : vector<8x96xf32> to vector<8x32xf32>
    %140 = arith.addf %138, %139 : vector<8x32xf32>
    %141 = arith.negf %140 : vector<8x32xf32>
    %142 = math.exp %141 : vector<8x32xf32>
    %cst_28 = arith.constant 1.000000e+00 : f32
    %143 = vector.broadcast %cst_28 : f32 to vector<8x32xf32>
    %144 = arith.addf %143, %142 : vector<8x32xf32>
    %145 = arith.divf %143, %144 : vector<8x32xf32>
    %146 = vector.extract_strided_slice %127 {offsets = [0, 64], sizes = [8, 32], strides = [1, 1]} : vector<8x96xf32> to vector<8x32xf32>
    %147 = vector.extract_strided_slice %129 {offsets = [0, 64], sizes = [8, 32], strides = [1, 1]} : vector<8x96xf32> to vector<8x32xf32>
    %148 = arith.mulf %137, %147 : vector<8x32xf32>
    %149 = arith.addf %146, %148 : vector<8x32xf32>
    %150 = math.tanh %149 : vector<8x32xf32>
    %cst_29 = arith.constant 1.000000e+00 : f32
    %151 = vector.broadcast %cst_29 : f32 to vector<8x32xf32>
    %152 = arith.subf %151, %145 : vector<8x32xf32>
    %153 = arith.mulf %152, %150 : vector<8x32xf32>
    %154 = arith.mulf %145, %126 : vector<8x32xf32>
    %155 = arith.addf %153, %154 : vector<8x32xf32>
    %156 = vector.extract_strided_slice %5 {offsets = [40, 0], sizes = [8, 96], strides = [1, 1]} : vector<64x96xf32> to vector<8x96xf32>
    %cst_30 = arith.constant dense<0.000000e+00> : vector<8x96xf32>
    %157 = tpu.matmul %155, %6, %cst_30 {dimension_numbers = #tpu.dot_dimension_numbers<[1], [0], [0], [1], [0, 0, 1, 1], [], []>} : vector<8x32xf32>, vector<32x96xf32>, vector<8x96xf32> -> vector<8x96xf32>
    %158 = arith.addf %157, %9 : vector<8x96xf32>
    %159 = vector.extract_strided_slice %156 {offsets = [0, 0], sizes = [8, 32], strides = [1, 1]} : vector<8x96xf32> to vector<8x32xf32>
    %160 = vector.extract_strided_slice %158 {offsets = [0, 0], sizes = [8, 32], strides = [1, 1]} : vector<8x96xf32> to vector<8x32xf32>
    %161 = arith.addf %159, %160 : vector<8x32xf32>
    %162 = arith.negf %161 : vector<8x32xf32>
    %163 = math.exp %162 : vector<8x32xf32>
    %cst_31 = arith.constant 1.000000e+00 : f32
    %164 = vector.broadcast %cst_31 : f32 to vector<8x32xf32>
    %165 = arith.addf %164, %163 : vector<8x32xf32>
    %166 = arith.divf %164, %165 : vector<8x32xf32>
    %167 = vector.extract_strided_slice %156 {offsets = [0, 32], sizes = [8, 32], strides = [1, 1]} : vector<8x96xf32> to vector<8x32xf32>
    %168 = vector.extract_strided_slice %158 {offsets = [0, 32], sizes = [8, 32], strides = [1, 1]} : vector<8x96xf32> to vector<8x32xf32>
    %169 = arith.addf %167, %168 : vector<8x32xf32>
    %170 = arith.negf %169 : vector<8x32xf32>
    %171 = math.exp %170 : vector<8x32xf32>
    %cst_32 = arith.constant 1.000000e+00 : f32
    %172 = vector.broadcast %cst_32 : f32 to vector<8x32xf32>
    %173 = arith.addf %172, %171 : vector<8x32xf32>
    %174 = arith.divf %172, %173 : vector<8x32xf32>
    %175 = vector.extract_strided_slice %156 {offsets = [0, 64], sizes = [8, 32], strides = [1, 1]} : vector<8x96xf32> to vector<8x32xf32>
    %176 = vector.extract_strided_slice %158 {offsets = [0, 64], sizes = [8, 32], strides = [1, 1]} : vector<8x96xf32> to vector<8x32xf32>
    %177 = arith.mulf %166, %176 : vector<8x32xf32>
    %178 = arith.addf %175, %177 : vector<8x32xf32>
    %179 = math.tanh %178 : vector<8x32xf32>
    %cst_33 = arith.constant 1.000000e+00 : f32
    %180 = vector.broadcast %cst_33 : f32 to vector<8x32xf32>
    %181 = arith.subf %180, %174 : vector<8x32xf32>
    %182 = arith.mulf %181, %179 : vector<8x32xf32>
    %183 = arith.mulf %174, %155 : vector<8x32xf32>
    %184 = arith.addf %182, %183 : vector<8x32xf32>
    %185 = vector.extract_strided_slice %5 {offsets = [48, 0], sizes = [8, 96], strides = [1, 1]} : vector<64x96xf32> to vector<8x96xf32>
    %cst_34 = arith.constant dense<0.000000e+00> : vector<8x96xf32>
    %186 = tpu.matmul %184, %6, %cst_34 {dimension_numbers = #tpu.dot_dimension_numbers<[1], [0], [0], [1], [0, 0, 1, 1], [], []>} : vector<8x32xf32>, vector<32x96xf32>, vector<8x96xf32> -> vector<8x96xf32>
    %187 = arith.addf %186, %9 : vector<8x96xf32>
    %188 = vector.extract_strided_slice %185 {offsets = [0, 0], sizes = [8, 32], strides = [1, 1]} : vector<8x96xf32> to vector<8x32xf32>
    %189 = vector.extract_strided_slice %187 {offsets = [0, 0], sizes = [8, 32], strides = [1, 1]} : vector<8x96xf32> to vector<8x32xf32>
    %190 = arith.addf %188, %189 : vector<8x32xf32>
    %191 = arith.negf %190 : vector<8x32xf32>
    %192 = math.exp %191 : vector<8x32xf32>
    %cst_35 = arith.constant 1.000000e+00 : f32
    %193 = vector.broadcast %cst_35 : f32 to vector<8x32xf32>
    %194 = arith.addf %193, %192 : vector<8x32xf32>
    %195 = arith.divf %193, %194 : vector<8x32xf32>
    %196 = vector.extract_strided_slice %185 {offsets = [0, 32], sizes = [8, 32], strides = [1, 1]} : vector<8x96xf32> to vector<8x32xf32>
    %197 = vector.extract_strided_slice %187 {offsets = [0, 32], sizes = [8, 32], strides = [1, 1]} : vector<8x96xf32> to vector<8x32xf32>
    %198 = arith.addf %196, %197 : vector<8x32xf32>
    %199 = arith.negf %198 : vector<8x32xf32>
    %200 = math.exp %199 : vector<8x32xf32>
    %cst_36 = arith.constant 1.000000e+00 : f32
    %201 = vector.broadcast %cst_36 : f32 to vector<8x32xf32>
    %202 = arith.addf %201, %200 : vector<8x32xf32>
    %203 = arith.divf %201, %202 : vector<8x32xf32>
    %204 = vector.extract_strided_slice %185 {offsets = [0, 64], sizes = [8, 32], strides = [1, 1]} : vector<8x96xf32> to vector<8x32xf32>
    %205 = vector.extract_strided_slice %187 {offsets = [0, 64], sizes = [8, 32], strides = [1, 1]} : vector<8x96xf32> to vector<8x32xf32>
    %206 = arith.mulf %195, %205 : vector<8x32xf32>
    %207 = arith.addf %204, %206 : vector<8x32xf32>
    %208 = math.tanh %207 : vector<8x32xf32>
    %cst_37 = arith.constant 1.000000e+00 : f32
    %209 = vector.broadcast %cst_37 : f32 to vector<8x32xf32>
    %210 = arith.subf %209, %203 : vector<8x32xf32>
    %211 = arith.mulf %210, %208 : vector<8x32xf32>
    %212 = arith.mulf %203, %184 : vector<8x32xf32>
    %213 = arith.addf %211, %212 : vector<8x32xf32>
    %214 = vector.extract_strided_slice %5 {offsets = [56, 0], sizes = [8, 96], strides = [1, 1]} : vector<64x96xf32> to vector<8x96xf32>
    %cst_38 = arith.constant dense<0.000000e+00> : vector<8x96xf32>
    %215 = tpu.matmul %213, %6, %cst_38 {dimension_numbers = #tpu.dot_dimension_numbers<[1], [0], [0], [1], [0, 0, 1, 1], [], []>} : vector<8x32xf32>, vector<32x96xf32>, vector<8x96xf32> -> vector<8x96xf32>
    %216 = arith.addf %215, %9 : vector<8x96xf32>
    %217 = vector.extract_strided_slice %214 {offsets = [0, 0], sizes = [8, 32], strides = [1, 1]} : vector<8x96xf32> to vector<8x32xf32>
    %218 = vector.extract_strided_slice %216 {offsets = [0, 0], sizes = [8, 32], strides = [1, 1]} : vector<8x96xf32> to vector<8x32xf32>
    %219 = arith.addf %217, %218 : vector<8x32xf32>
    %220 = arith.negf %219 : vector<8x32xf32>
    %221 = math.exp %220 : vector<8x32xf32>
    %cst_39 = arith.constant 1.000000e+00 : f32
    %222 = vector.broadcast %cst_39 : f32 to vector<8x32xf32>
    %223 = arith.addf %222, %221 : vector<8x32xf32>
    %224 = arith.divf %222, %223 : vector<8x32xf32>
    %225 = vector.extract_strided_slice %214 {offsets = [0, 32], sizes = [8, 32], strides = [1, 1]} : vector<8x96xf32> to vector<8x32xf32>
    %226 = vector.extract_strided_slice %216 {offsets = [0, 32], sizes = [8, 32], strides = [1, 1]} : vector<8x96xf32> to vector<8x32xf32>
    %227 = arith.addf %225, %226 : vector<8x32xf32>
    %228 = arith.negf %227 : vector<8x32xf32>
    %229 = math.exp %228 : vector<8x32xf32>
    %cst_40 = arith.constant 1.000000e+00 : f32
    %230 = vector.broadcast %cst_40 : f32 to vector<8x32xf32>
    %231 = arith.addf %230, %229 : vector<8x32xf32>
    %232 = arith.divf %230, %231 : vector<8x32xf32>
    %233 = vector.extract_strided_slice %214 {offsets = [0, 64], sizes = [8, 32], strides = [1, 1]} : vector<8x96xf32> to vector<8x32xf32>
    %234 = vector.extract_strided_slice %216 {offsets = [0, 64], sizes = [8, 32], strides = [1, 1]} : vector<8x96xf32> to vector<8x32xf32>
    %235 = arith.mulf %224, %234 : vector<8x32xf32>
    %236 = arith.addf %233, %235 : vector<8x32xf32>
    %237 = math.tanh %236 : vector<8x32xf32>
    %cst_41 = arith.constant 1.000000e+00 : f32
    %238 = vector.broadcast %cst_41 : f32 to vector<8x32xf32>
    %239 = arith.subf %238, %232 : vector<8x32xf32>
    %240 = arith.mulf %239, %237 : vector<8x32xf32>
    %241 = arith.mulf %232, %213 : vector<8x32xf32>
    %242 = arith.addf %240, %241 : vector<8x32xf32>
    %c0_42 = arith.constant 0 : index
    %c0_43 = arith.constant 0 : index
    %243 = vector.load %arg1[%c0_42, %c0_43] : memref<32x8xf32, #tpu.memory_space<vmem>>, vector<32x8xf32>
    %c0_44 = arith.constant 0 : index
    %c0_45 = arith.constant 0 : index
    %244 = vector.load %arg7[%c0_44, %c0_45] : memref<8x96xf32, #tpu.memory_space<vmem>>, vector<8x96xf32>
    %cst_46 = arith.constant dense<0.000000e+00> : vector<32x96xf32>
    %245 = tpu.matmul %243, %244, %cst_46 {dimension_numbers = #tpu.dot_dimension_numbers<[1], [0], [0], [1], [0, 0, 1, 1], [], []>} : vector<32x8xf32>, vector<8x96xf32>, vector<32x96xf32> -> vector<32x96xf32>
    %c0_47 = arith.constant 0 : index
    %c0_48 = arith.constant 0 : index
    %246 = vector.load %arg9[%c0_47, %c0_48] : memref<1x96xf32, #tpu.memory_space<vmem>>, vector<1x96xf32>
    %247 = vector.broadcast %246 : vector<1x96xf32> to vector<32x96xf32>
    %248 = arith.addf %245, %247 : vector<32x96xf32>
    %c0_49 = arith.constant 0 : index
    %c0_50 = arith.constant 0 : index
    %249 = vector.load %arg8[%c0_49, %c0_50] : memref<32x96xf32, #tpu.memory_space<vmem>>, vector<32x96xf32>
    %c0_51 = arith.constant 0 : index
    %c0_52 = arith.constant 0 : index
    %250 = vector.load %arg10[%c0_51, %c0_52] : memref<1x96xf32, #tpu.memory_space<vmem>>, vector<1x96xf32>
    %251 = vector.shape_cast %250 : vector<1x96xf32> to vector<1x96xf32>
    %252 = vector.broadcast %251 : vector<1x96xf32> to vector<8x96xf32>
    %cst_53 = arith.constant 0.000000e+00 : f32
    %253 = vector.broadcast %cst_53 : f32 to vector<8x32xf32>
    %254 = vector.extract_strided_slice %248 {offsets = [0, 0], sizes = [8, 96], strides = [1, 1]} : vector<32x96xf32> to vector<8x96xf32>
    %cst_54 = arith.constant dense<0.000000e+00> : vector<8x96xf32>
    %255 = tpu.matmul %253, %249, %cst_54 {dimension_numbers = #tpu.dot_dimension_numbers<[1], [0], [0], [1], [0, 0, 1, 1], [], []>} : vector<8x32xf32>, vector<32x96xf32>, vector<8x96xf32> -> vector<8x96xf32>
    %256 = arith.addf %255, %252 : vector<8x96xf32>
    %257 = vector.extract_strided_slice %254 {offsets = [0, 0], sizes = [8, 32], strides = [1, 1]} : vector<8x96xf32> to vector<8x32xf32>
    %258 = vector.extract_strided_slice %256 {offsets = [0, 0], sizes = [8, 32], strides = [1, 1]} : vector<8x96xf32> to vector<8x32xf32>
    %259 = arith.addf %257, %258 : vector<8x32xf32>
    %260 = arith.negf %259 : vector<8x32xf32>
    %261 = math.exp %260 : vector<8x32xf32>
    %cst_55 = arith.constant 1.000000e+00 : f32
    %262 = vector.broadcast %cst_55 : f32 to vector<8x32xf32>
    %263 = arith.addf %262, %261 : vector<8x32xf32>
    %264 = arith.divf %262, %263 : vector<8x32xf32>
    %265 = vector.extract_strided_slice %254 {offsets = [0, 32], sizes = [8, 32], strides = [1, 1]} : vector<8x96xf32> to vector<8x32xf32>
    %266 = vector.extract_strided_slice %256 {offsets = [0, 32], sizes = [8, 32], strides = [1, 1]} : vector<8x96xf32> to vector<8x32xf32>
    %267 = arith.addf %265, %266 : vector<8x32xf32>
    %268 = arith.negf %267 : vector<8x32xf32>
    %269 = math.exp %268 : vector<8x32xf32>
    %cst_56 = arith.constant 1.000000e+00 : f32
    %270 = vector.broadcast %cst_56 : f32 to vector<8x32xf32>
    %271 = arith.addf %270, %269 : vector<8x32xf32>
    %272 = arith.divf %270, %271 : vector<8x32xf32>
    %273 = vector.extract_strided_slice %254 {offsets = [0, 64], sizes = [8, 32], strides = [1, 1]} : vector<8x96xf32> to vector<8x32xf32>
    %274 = vector.extract_strided_slice %256 {offsets = [0, 64], sizes = [8, 32], strides = [1, 1]} : vector<8x96xf32> to vector<8x32xf32>
    %275 = arith.mulf %264, %274 : vector<8x32xf32>
    %276 = arith.addf %273, %275 : vector<8x32xf32>
    %277 = math.tanh %276 : vector<8x32xf32>
    %cst_57 = arith.constant 1.000000e+00 : f32
    %278 = vector.broadcast %cst_57 : f32 to vector<8x32xf32>
    %279 = arith.subf %278, %272 : vector<8x32xf32>
    %280 = arith.mulf %279, %277 : vector<8x32xf32>
    %281 = arith.mulf %272, %253 : vector<8x32xf32>
    %282 = arith.addf %280, %281 : vector<8x32xf32>
    %283 = vector.extract_strided_slice %248 {offsets = [8, 0], sizes = [8, 96], strides = [1, 1]} : vector<32x96xf32> to vector<8x96xf32>
    %cst_58 = arith.constant dense<0.000000e+00> : vector<8x96xf32>
    %284 = tpu.matmul %282, %249, %cst_58 {dimension_numbers = #tpu.dot_dimension_numbers<[1], [0], [0], [1], [0, 0, 1, 1], [], []>} : vector<8x32xf32>, vector<32x96xf32>, vector<8x96xf32> -> vector<8x96xf32>
    %285 = arith.addf %284, %252 : vector<8x96xf32>
    %286 = vector.extract_strided_slice %283 {offsets = [0, 0], sizes = [8, 32], strides = [1, 1]} : vector<8x96xf32> to vector<8x32xf32>
    %287 = vector.extract_strided_slice %285 {offsets = [0, 0], sizes = [8, 32], strides = [1, 1]} : vector<8x96xf32> to vector<8x32xf32>
    %288 = arith.addf %286, %287 : vector<8x32xf32>
    %289 = arith.negf %288 : vector<8x32xf32>
    %290 = math.exp %289 : vector<8x32xf32>
    %cst_59 = arith.constant 1.000000e+00 : f32
    %291 = vector.broadcast %cst_59 : f32 to vector<8x32xf32>
    %292 = arith.addf %291, %290 : vector<8x32xf32>
    %293 = arith.divf %291, %292 : vector<8x32xf32>
    %294 = vector.extract_strided_slice %283 {offsets = [0, 32], sizes = [8, 32], strides = [1, 1]} : vector<8x96xf32> to vector<8x32xf32>
    %295 = vector.extract_strided_slice %285 {offsets = [0, 32], sizes = [8, 32], strides = [1, 1]} : vector<8x96xf32> to vector<8x32xf32>
    %296 = arith.addf %294, %295 : vector<8x32xf32>
    %297 = arith.negf %296 : vector<8x32xf32>
    %298 = math.exp %297 : vector<8x32xf32>
    %cst_60 = arith.constant 1.000000e+00 : f32
    %299 = vector.broadcast %cst_60 : f32 to vector<8x32xf32>
    %300 = arith.addf %299, %298 : vector<8x32xf32>
    %301 = arith.divf %299, %300 : vector<8x32xf32>
    %302 = vector.extract_strided_slice %283 {offsets = [0, 64], sizes = [8, 32], strides = [1, 1]} : vector<8x96xf32> to vector<8x32xf32>
    %303 = vector.extract_strided_slice %285 {offsets = [0, 64], sizes = [8, 32], strides = [1, 1]} : vector<8x96xf32> to vector<8x32xf32>
    %304 = arith.mulf %293, %303 : vector<8x32xf32>
    %305 = arith.addf %302, %304 : vector<8x32xf32>
    %306 = math.tanh %305 : vector<8x32xf32>
    %cst_61 = arith.constant 1.000000e+00 : f32
    %307 = vector.broadcast %cst_61 : f32 to vector<8x32xf32>
    %308 = arith.subf %307, %301 : vector<8x32xf32>
    %309 = arith.mulf %308, %306 : vector<8x32xf32>
    %310 = arith.mulf %301, %282 : vector<8x32xf32>
    %311 = arith.addf %309, %310 : vector<8x32xf32>
    %312 = vector.extract_strided_slice %248 {offsets = [16, 0], sizes = [8, 96], strides = [1, 1]} : vector<32x96xf32> to vector<8x96xf32>
    %cst_62 = arith.constant dense<0.000000e+00> : vector<8x96xf32>
    %313 = tpu.matmul %311, %249, %cst_62 {dimension_numbers = #tpu.dot_dimension_numbers<[1], [0], [0], [1], [0, 0, 1, 1], [], []>} : vector<8x32xf32>, vector<32x96xf32>, vector<8x96xf32> -> vector<8x96xf32>
    %314 = arith.addf %313, %252 : vector<8x96xf32>
    %315 = vector.extract_strided_slice %312 {offsets = [0, 0], sizes = [8, 32], strides = [1, 1]} : vector<8x96xf32> to vector<8x32xf32>
    %316 = vector.extract_strided_slice %314 {offsets = [0, 0], sizes = [8, 32], strides = [1, 1]} : vector<8x96xf32> to vector<8x32xf32>
    %317 = arith.addf %315, %316 : vector<8x32xf32>
    %318 = arith.negf %317 : vector<8x32xf32>
    %319 = math.exp %318 : vector<8x32xf32>
    %cst_63 = arith.constant 1.000000e+00 : f32
    %320 = vector.broadcast %cst_63 : f32 to vector<8x32xf32>
    %321 = arith.addf %320, %319 : vector<8x32xf32>
    %322 = arith.divf %320, %321 : vector<8x32xf32>
    %323 = vector.extract_strided_slice %312 {offsets = [0, 32], sizes = [8, 32], strides = [1, 1]} : vector<8x96xf32> to vector<8x32xf32>
    %324 = vector.extract_strided_slice %314 {offsets = [0, 32], sizes = [8, 32], strides = [1, 1]} : vector<8x96xf32> to vector<8x32xf32>
    %325 = arith.addf %323, %324 : vector<8x32xf32>
    %326 = arith.negf %325 : vector<8x32xf32>
    %327 = math.exp %326 : vector<8x32xf32>
    %cst_64 = arith.constant 1.000000e+00 : f32
    %328 = vector.broadcast %cst_64 : f32 to vector<8x32xf32>
    %329 = arith.addf %328, %327 : vector<8x32xf32>
    %330 = arith.divf %328, %329 : vector<8x32xf32>
    %331 = vector.extract_strided_slice %312 {offsets = [0, 64], sizes = [8, 32], strides = [1, 1]} : vector<8x96xf32> to vector<8x32xf32>
    %332 = vector.extract_strided_slice %314 {offsets = [0, 64], sizes = [8, 32], strides = [1, 1]} : vector<8x96xf32> to vector<8x32xf32>
    %333 = arith.mulf %322, %332 : vector<8x32xf32>
    %334 = arith.addf %331, %333 : vector<8x32xf32>
    %335 = math.tanh %334 : vector<8x32xf32>
    %cst_65 = arith.constant 1.000000e+00 : f32
    %336 = vector.broadcast %cst_65 : f32 to vector<8x32xf32>
    %337 = arith.subf %336, %330 : vector<8x32xf32>
    %338 = arith.mulf %337, %335 : vector<8x32xf32>
    %339 = arith.mulf %330, %311 : vector<8x32xf32>
    %340 = arith.addf %338, %339 : vector<8x32xf32>
    %341 = vector.extract_strided_slice %248 {offsets = [24, 0], sizes = [8, 96], strides = [1, 1]} : vector<32x96xf32> to vector<8x96xf32>
    %cst_66 = arith.constant dense<0.000000e+00> : vector<8x96xf32>
    %342 = tpu.matmul %340, %249, %cst_66 {dimension_numbers = #tpu.dot_dimension_numbers<[1], [0], [0], [1], [0, 0, 1, 1], [], []>} : vector<8x32xf32>, vector<32x96xf32>, vector<8x96xf32> -> vector<8x96xf32>
    %343 = arith.addf %342, %252 : vector<8x96xf32>
    %344 = vector.extract_strided_slice %341 {offsets = [0, 0], sizes = [8, 32], strides = [1, 1]} : vector<8x96xf32> to vector<8x32xf32>
    %345 = vector.extract_strided_slice %343 {offsets = [0, 0], sizes = [8, 32], strides = [1, 1]} : vector<8x96xf32> to vector<8x32xf32>
    %346 = arith.addf %344, %345 : vector<8x32xf32>
    %347 = arith.negf %346 : vector<8x32xf32>
    %348 = math.exp %347 : vector<8x32xf32>
    %cst_67 = arith.constant 1.000000e+00 : f32
    %349 = vector.broadcast %cst_67 : f32 to vector<8x32xf32>
    %350 = arith.addf %349, %348 : vector<8x32xf32>
    %351 = arith.divf %349, %350 : vector<8x32xf32>
    %352 = vector.extract_strided_slice %341 {offsets = [0, 32], sizes = [8, 32], strides = [1, 1]} : vector<8x96xf32> to vector<8x32xf32>
    %353 = vector.extract_strided_slice %343 {offsets = [0, 32], sizes = [8, 32], strides = [1, 1]} : vector<8x96xf32> to vector<8x32xf32>
    %354 = arith.addf %352, %353 : vector<8x32xf32>
    %355 = arith.negf %354 : vector<8x32xf32>
    %356 = math.exp %355 : vector<8x32xf32>
    %cst_68 = arith.constant 1.000000e+00 : f32
    %357 = vector.broadcast %cst_68 : f32 to vector<8x32xf32>
    %358 = arith.addf %357, %356 : vector<8x32xf32>
    %359 = arith.divf %357, %358 : vector<8x32xf32>
    %360 = vector.extract_strided_slice %341 {offsets = [0, 64], sizes = [8, 32], strides = [1, 1]} : vector<8x96xf32> to vector<8x32xf32>
    %361 = vector.extract_strided_slice %343 {offsets = [0, 64], sizes = [8, 32], strides = [1, 1]} : vector<8x96xf32> to vector<8x32xf32>
    %362 = arith.mulf %351, %361 : vector<8x32xf32>
    %363 = arith.addf %360, %362 : vector<8x32xf32>
    %364 = math.tanh %363 : vector<8x32xf32>
    %cst_69 = arith.constant 1.000000e+00 : f32
    %365 = vector.broadcast %cst_69 : f32 to vector<8x32xf32>
    %366 = arith.subf %365, %359 : vector<8x32xf32>
    %367 = arith.mulf %366, %364 : vector<8x32xf32>
    %368 = arith.mulf %359, %340 : vector<8x32xf32>
    %369 = arith.addf %367, %368 : vector<8x32xf32>
    %c0_70 = arith.constant 0 : index
    %c0_71 = arith.constant 0 : index
    %370 = vector.load %arg2[%c0_70, %c0_71] : memref<24x8xf32, #tpu.memory_space<vmem>>, vector<24x8xf32>
    %c0_72 = arith.constant 0 : index
    %c0_73 = arith.constant 0 : index
    %371 = vector.load %arg11[%c0_72, %c0_73] : memref<8x96xf32, #tpu.memory_space<vmem>>, vector<8x96xf32>
    %cst_74 = arith.constant dense<0.000000e+00> : vector<24x96xf32>
    %372 = tpu.matmul %370, %371, %cst_74 {dimension_numbers = #tpu.dot_dimension_numbers<[1], [0], [0], [1], [0, 0, 1, 1], [], []>} : vector<24x8xf32>, vector<8x96xf32>, vector<24x96xf32> -> vector<24x96xf32>
    %c0_75 = arith.constant 0 : index
    %c0_76 = arith.constant 0 : index
    %373 = vector.load %arg13[%c0_75, %c0_76] : memref<1x96xf32, #tpu.memory_space<vmem>>, vector<1x96xf32>
    %374 = vector.broadcast %373 : vector<1x96xf32> to vector<24x96xf32>
    %375 = arith.addf %372, %374 : vector<24x96xf32>
    %c0_77 = arith.constant 0 : index
    %c0_78 = arith.constant 0 : index
    %376 = vector.load %arg12[%c0_77, %c0_78] : memref<32x96xf32, #tpu.memory_space<vmem>>, vector<32x96xf32>
    %c0_79 = arith.constant 0 : index
    %c0_80 = arith.constant 0 : index
    %377 = vector.load %arg14[%c0_79, %c0_80] : memref<1x96xf32, #tpu.memory_space<vmem>>, vector<1x96xf32>
    %378 = vector.shape_cast %377 : vector<1x96xf32> to vector<1x96xf32>
    %379 = vector.broadcast %378 : vector<1x96xf32> to vector<8x96xf32>
    %cst_81 = arith.constant 0.000000e+00 : f32
    %380 = vector.broadcast %cst_81 : f32 to vector<8x32xf32>
    %381 = vector.extract_strided_slice %375 {offsets = [0, 0], sizes = [8, 96], strides = [1, 1]} : vector<24x96xf32> to vector<8x96xf32>
    %cst_82 = arith.constant dense<0.000000e+00> : vector<8x96xf32>
    %382 = tpu.matmul %380, %376, %cst_82 {dimension_numbers = #tpu.dot_dimension_numbers<[1], [0], [0], [1], [0, 0, 1, 1], [], []>} : vector<8x32xf32>, vector<32x96xf32>, vector<8x96xf32> -> vector<8x96xf32>
    %383 = arith.addf %382, %379 : vector<8x96xf32>
    %384 = vector.extract_strided_slice %381 {offsets = [0, 0], sizes = [8, 32], strides = [1, 1]} : vector<8x96xf32> to vector<8x32xf32>
    %385 = vector.extract_strided_slice %383 {offsets = [0, 0], sizes = [8, 32], strides = [1, 1]} : vector<8x96xf32> to vector<8x32xf32>
    %386 = arith.addf %384, %385 : vector<8x32xf32>
    %387 = arith.negf %386 : vector<8x32xf32>
    %388 = math.exp %387 : vector<8x32xf32>
    %cst_83 = arith.constant 1.000000e+00 : f32
    %389 = vector.broadcast %cst_83 : f32 to vector<8x32xf32>
    %390 = arith.addf %389, %388 : vector<8x32xf32>
    %391 = arith.divf %389, %390 : vector<8x32xf32>
    %392 = vector.extract_strided_slice %381 {offsets = [0, 32], sizes = [8, 32], strides = [1, 1]} : vector<8x96xf32> to vector<8x32xf32>
    %393 = vector.extract_strided_slice %383 {offsets = [0, 32], sizes = [8, 32], strides = [1, 1]} : vector<8x96xf32> to vector<8x32xf32>
    %394 = arith.addf %392, %393 : vector<8x32xf32>
    %395 = arith.negf %394 : vector<8x32xf32>
    %396 = math.exp %395 : vector<8x32xf32>
    %cst_84 = arith.constant 1.000000e+00 : f32
    %397 = vector.broadcast %cst_84 : f32 to vector<8x32xf32>
    %398 = arith.addf %397, %396 : vector<8x32xf32>
    %399 = arith.divf %397, %398 : vector<8x32xf32>
    %400 = vector.extract_strided_slice %381 {offsets = [0, 64], sizes = [8, 32], strides = [1, 1]} : vector<8x96xf32> to vector<8x32xf32>
    %401 = vector.extract_strided_slice %383 {offsets = [0, 64], sizes = [8, 32], strides = [1, 1]} : vector<8x96xf32> to vector<8x32xf32>
    %402 = arith.mulf %391, %401 : vector<8x32xf32>
    %403 = arith.addf %400, %402 : vector<8x32xf32>
    %404 = math.tanh %403 : vector<8x32xf32>
    %cst_85 = arith.constant 1.000000e+00 : f32
    %405 = vector.broadcast %cst_85 : f32 to vector<8x32xf32>
    %406 = arith.subf %405, %399 : vector<8x32xf32>
    %407 = arith.mulf %406, %404 : vector<8x32xf32>
    %408 = arith.mulf %399, %380 : vector<8x32xf32>
    %409 = arith.addf %407, %408 : vector<8x32xf32>
    %410 = vector.extract_strided_slice %375 {offsets = [8, 0], sizes = [8, 96], strides = [1, 1]} : vector<24x96xf32> to vector<8x96xf32>
    %cst_86 = arith.constant dense<0.000000e+00> : vector<8x96xf32>
    %411 = tpu.matmul %409, %376, %cst_86 {dimension_numbers = #tpu.dot_dimension_numbers<[1], [0], [0], [1], [0, 0, 1, 1], [], []>} : vector<8x32xf32>, vector<32x96xf32>, vector<8x96xf32> -> vector<8x96xf32>
    %412 = arith.addf %411, %379 : vector<8x96xf32>
    %413 = vector.extract_strided_slice %410 {offsets = [0, 0], sizes = [8, 32], strides = [1, 1]} : vector<8x96xf32> to vector<8x32xf32>
    %414 = vector.extract_strided_slice %412 {offsets = [0, 0], sizes = [8, 32], strides = [1, 1]} : vector<8x96xf32> to vector<8x32xf32>
    %415 = arith.addf %413, %414 : vector<8x32xf32>
    %416 = arith.negf %415 : vector<8x32xf32>
    %417 = math.exp %416 : vector<8x32xf32>
    %cst_87 = arith.constant 1.000000e+00 : f32
    %418 = vector.broadcast %cst_87 : f32 to vector<8x32xf32>
    %419 = arith.addf %418, %417 : vector<8x32xf32>
    %420 = arith.divf %418, %419 : vector<8x32xf32>
    %421 = vector.extract_strided_slice %410 {offsets = [0, 32], sizes = [8, 32], strides = [1, 1]} : vector<8x96xf32> to vector<8x32xf32>
    %422 = vector.extract_strided_slice %412 {offsets = [0, 32], sizes = [8, 32], strides = [1, 1]} : vector<8x96xf32> to vector<8x32xf32>
    %423 = arith.addf %421, %422 : vector<8x32xf32>
    %424 = arith.negf %423 : vector<8x32xf32>
    %425 = math.exp %424 : vector<8x32xf32>
    %cst_88 = arith.constant 1.000000e+00 : f32
    %426 = vector.broadcast %cst_88 : f32 to vector<8x32xf32>
    %427 = arith.addf %426, %425 : vector<8x32xf32>
    %428 = arith.divf %426, %427 : vector<8x32xf32>
    %429 = vector.extract_strided_slice %410 {offsets = [0, 64], sizes = [8, 32], strides = [1, 1]} : vector<8x96xf32> to vector<8x32xf32>
    %430 = vector.extract_strided_slice %412 {offsets = [0, 64], sizes = [8, 32], strides = [1, 1]} : vector<8x96xf32> to vector<8x32xf32>
    %431 = arith.mulf %420, %430 : vector<8x32xf32>
    %432 = arith.addf %429, %431 : vector<8x32xf32>
    %433 = math.tanh %432 : vector<8x32xf32>
    %cst_89 = arith.constant 1.000000e+00 : f32
    %434 = vector.broadcast %cst_89 : f32 to vector<8x32xf32>
    %435 = arith.subf %434, %428 : vector<8x32xf32>
    %436 = arith.mulf %435, %433 : vector<8x32xf32>
    %437 = arith.mulf %428, %409 : vector<8x32xf32>
    %438 = arith.addf %436, %437 : vector<8x32xf32>
    %439 = vector.extract_strided_slice %375 {offsets = [16, 0], sizes = [8, 96], strides = [1, 1]} : vector<24x96xf32> to vector<8x96xf32>
    %cst_90 = arith.constant dense<0.000000e+00> : vector<8x96xf32>
    %440 = tpu.matmul %438, %376, %cst_90 {dimension_numbers = #tpu.dot_dimension_numbers<[1], [0], [0], [1], [0, 0, 1, 1], [], []>} : vector<8x32xf32>, vector<32x96xf32>, vector<8x96xf32> -> vector<8x96xf32>
    %441 = arith.addf %440, %379 : vector<8x96xf32>
    %442 = vector.extract_strided_slice %439 {offsets = [0, 0], sizes = [8, 32], strides = [1, 1]} : vector<8x96xf32> to vector<8x32xf32>
    %443 = vector.extract_strided_slice %441 {offsets = [0, 0], sizes = [8, 32], strides = [1, 1]} : vector<8x96xf32> to vector<8x32xf32>
    %444 = arith.addf %442, %443 : vector<8x32xf32>
    %445 = arith.negf %444 : vector<8x32xf32>
    %446 = math.exp %445 : vector<8x32xf32>
    %cst_91 = arith.constant 1.000000e+00 : f32
    %447 = vector.broadcast %cst_91 : f32 to vector<8x32xf32>
    %448 = arith.addf %447, %446 : vector<8x32xf32>
    %449 = arith.divf %447, %448 : vector<8x32xf32>
    %450 = vector.extract_strided_slice %439 {offsets = [0, 32], sizes = [8, 32], strides = [1, 1]} : vector<8x96xf32> to vector<8x32xf32>
    %451 = vector.extract_strided_slice %441 {offsets = [0, 32], sizes = [8, 32], strides = [1, 1]} : vector<8x96xf32> to vector<8x32xf32>
    %452 = arith.addf %450, %451 : vector<8x32xf32>
    %453 = arith.negf %452 : vector<8x32xf32>
    %454 = math.exp %453 : vector<8x32xf32>
    %cst_92 = arith.constant 1.000000e+00 : f32
    %455 = vector.broadcast %cst_92 : f32 to vector<8x32xf32>
    %456 = arith.addf %455, %454 : vector<8x32xf32>
    %457 = arith.divf %455, %456 : vector<8x32xf32>
    %458 = vector.extract_strided_slice %439 {offsets = [0, 64], sizes = [8, 32], strides = [1, 1]} : vector<8x96xf32> to vector<8x32xf32>
    %459 = vector.extract_strided_slice %441 {offsets = [0, 64], sizes = [8, 32], strides = [1, 1]} : vector<8x96xf32> to vector<8x32xf32>
    %460 = arith.mulf %449, %459 : vector<8x32xf32>
    %461 = arith.addf %458, %460 : vector<8x32xf32>
    %462 = math.tanh %461 : vector<8x32xf32>
    %cst_93 = arith.constant 1.000000e+00 : f32
    %463 = vector.broadcast %cst_93 : f32 to vector<8x32xf32>
    %464 = arith.subf %463, %457 : vector<8x32xf32>
    %465 = arith.mulf %464, %462 : vector<8x32xf32>
    %466 = arith.mulf %457, %438 : vector<8x32xf32>
    %467 = arith.addf %465, %466 : vector<8x32xf32>
    %c0_94 = arith.constant 0 : index
    %c0_95 = arith.constant 0 : index
    %468 = vector.load %arg15[%c0_94, %c0_95] : memref<32x32xf32, #tpu.memory_space<vmem>>, vector<32x32xf32>
    %cst_96 = arith.constant dense<0.000000e+00> : vector<8x32xf32>
    %469 = tpu.matmul %242, %468, %cst_96 {dimension_numbers = #tpu.dot_dimension_numbers<[1], [0], [0], [1], [0, 0, 1, 1], [], []>} : vector<8x32xf32>, vector<32x32xf32>, vector<8x32xf32> -> vector<8x32xf32>
    %c0_97 = arith.constant 0 : index
    %c0_98 = arith.constant 0 : index
    %470 = vector.load %arg16[%c0_97, %c0_98] : memref<32x32xf32, #tpu.memory_space<vmem>>, vector<32x32xf32>
    %cst_99 = arith.constant dense<0.000000e+00> : vector<8x32xf32>
    %471 = tpu.matmul %369, %470, %cst_99 {dimension_numbers = #tpu.dot_dimension_numbers<[1], [0], [0], [1], [0, 0, 1, 1], [], []>} : vector<8x32xf32>, vector<32x32xf32>, vector<8x32xf32> -> vector<8x32xf32>
    %472 = arith.addf %469, %471 : vector<8x32xf32>
    %c0_100 = arith.constant 0 : index
    %c0_101 = arith.constant 0 : index
    %473 = vector.load %arg17[%c0_100, %c0_101] : memref<32x32xf32, #tpu.memory_space<vmem>>, vector<32x32xf32>
    %cst_102 = arith.constant dense<0.000000e+00> : vector<8x32xf32>
    %474 = tpu.matmul %467, %473, %cst_102 {dimension_numbers = #tpu.dot_dimension_numbers<[1], [0], [0], [1], [0, 0, 1, 1], [], []>} : vector<8x32xf32>, vector<32x32xf32>, vector<8x32xf32> -> vector<8x32xf32>
    %475 = arith.addf %472, %474 : vector<8x32xf32>
    %c0_103 = arith.constant 0 : index
    %c0_104 = arith.constant 0 : index
    %476 = vector.load %arg18[%c0_103, %c0_104] : memref<1x32xf32, #tpu.memory_space<vmem>>, vector<1x32xf32>
    %477 = vector.broadcast %476 : vector<1x32xf32> to vector<8x32xf32>
    %478 = arith.addf %475, %477 : vector<8x32xf32>
    %cst_105 = arith.constant 0.000000e+00 : f32
    %479 = vector.broadcast %cst_105 : f32 to vector<8x32xf32>
    %480 = arith.maximumf %478, %479 : vector<8x32xf32>
    %c0_106 = arith.constant 0 : index
    %c0_107 = arith.constant 0 : index
    %481 = vector.load %arg19[%c0_106, %c0_107] : memref<1x32xf32, #tpu.memory_space<vmem>>, vector<1x32xf32>
    %482 = vector.broadcast %481 : vector<1x32xf32> to vector<8x32xf32>
    %483 = arith.mulf %480, %482 : vector<8x32xf32>
    %cst_108 = arith.constant dense<0.000000e+00> : vector<8xf32>
    %484 = vector.multi_reduction <add>, %483, %cst_108 [1] : vector<8x32xf32> to vector<8xf32>
    %485 = vector.shape_cast %484 : vector<8xf32> to vector<8x1xf32>
    %c0_109 = arith.constant 0 : index
    %c0_110 = arith.constant 0 : index
    %486 = vector.load %arg20[%c0_109, %c0_110] : memref<1x1xf32, #tpu.memory_space<vmem>>, vector<1x1xf32>
    %487 = vector.broadcast %486 : vector<1x1xf32> to vector<8x1xf32>
    %488 = arith.addf %485, %487 : vector<8x1xf32>
    %489 = vector.shape_cast %488 : vector<8x1xf32> to vector<8x1xf32>
    %490 = vector.broadcast %489 : vector<8x1xf32> to vector<8x128xf32>
    %c0_111 = arith.constant 0 : index
    %c0_112 = arith.constant 0 : index
    %491 = vector.load %arg21[%c0_111, %c0_112] : memref<8x128xf32, #tpu.memory_space<vmem>>, vector<8x128xf32>
    tpu.vector_store %arg21[%c0_111, %c0_112], %490 {strides = array<i32>} : memref<8x128xf32, #tpu.memory_space<vmem>>, vector<8x128xf32>,
    return
  }
}

</mosaic_0001>

<bundles_post_ra>
// kernel: fund_gru_forward.1
= control target key start
LH: loop header
LB: loop body
LE: loop exit
PB: predicated region body
PF: predicated region fallthrough
CT: control target
= control target key end

     0   :  { %vm86_vm0 = vcmask 64512   ;;  %v2732_v5 = vmov 0.0   ;;  %vm2733_vm1 = vmmov 0   ;;  %s2734_s24 = smov 64   ;;  %s2735_s27 = smov 96   ;;  %vm227_vm2 = vcmask 261120   ;;  %s3370_s3 = inlined_call_operand.vmem [shape: f32[8,96], index: 3, kind: input, shape index: {}]   ;;  %s3371_s0 = inlined_call_operand.vmem [shape: f32[64,8], index: 0, kind: input, shape index: {}]   ;;  %s3372_s4 = inlined_call_operand.vmem [shape: f32[32,96], index: 4, kind: input, shape index: {}]   ;;  %s3373_s6 = inlined_call_operand.vmem [shape: f32[1,96], index: 6, kind: input, shape index: {}]   ;;  %s3374_s5 = inlined_call_operand.vmem [shape: f32[1,96], index: 5, kind: input, shape index: {}]   ;;  %s3375_s7 = inlined_call_operand.vmem [shape: f32[8,96], index: 7, kind: input, shape index: {}]   ;;  %s3376_s1 = inlined_call_operand.vmem [shape: f32[32,8], index: 1, kind: input, shape index: {}]   ;;  %s3377_s8 = inlined_call_operand.vmem [shape: f32[32,96], index: 8, kind: input, shape index: {}]   ;;  %s3378_s9 = inlined_call_operand.vmem [shape: f32[1,96], index: 9, kind: input, shape index: {}]   ;;  %s3379_s10 = inlined_call_operand.vmem [shape: f32[1,96], index: 10, kind: input, shape index: {}]   ;;  %s3380_s12 = inlined_call_operand.vmem [shape: f32[32,96], index: 12, kind: input, shape index: {}]   ;;  %s3381_s11 = inlined_call_operand.vmem [shape: f32[8,96], index: 11, kind: input, shape index: {}]   ;;  %s3382_s2 = inlined_call_operand.vmem [shape: f32[24,8], index: 2, kind: input, shape index: {}]   ;;  %s3383_s14 = inlined_call_operand.vmem [shape: f32[1,96], index: 14, kind: input, shape index: {}]   ;;  %s3384_s13 = inlined_call_operand.vmem [shape: f32[1,96], index: 13, kind: input, shape index: {}]   ;;  %s3385_s16 = inlined_call_operand.vmem [shape: f32[32,32], index: 16, kind: input, shape index: {}]   ;;  %s3386_s15 = inlined_call_operand.vmem [shape: f32[32,32], index: 15, kind: input, shape index: {}]   ;;  %s3387_s17 = inlined_call_operand.vmem [shape: f32[32,32], index: 17, kind: input, shape index: {}]   ;;  %s3388_s20 = inlined_call_operand.<no memory space> [shape: f32[1,1], index: 20, kind: input, shape index: {}]   ;;  %s3389_s18 = inlined_call_operand.vmem [shape: f32[1,32], index: 18, kind: input, shape index: {}]   ;;  %s3390_s19 = inlined_call_operand.vmem [shape: f32[1,32], index: 19, kind: input, shape index: {}]   ;;  %s3391_s21 = inlined_call_operand.vmem [shape: f32[8,128], index: 21, kind: output, shape index: {}]  }
   0x1   :  { %3396 = sst [smem:[#allocation3_spill]] %s3370_s3 }
   0x2   :  { %3397 = sst [smem:[#allocation4_spill]] %s3371_s0 }
   0x3   :  { %3398 = sst [smem:[#allocation5_spill]] %s3372_s4 }
   0x4   :  { %3399 = sst [smem:[#allocation6_spill]] %s3373_s6 }
   0x5   :  { %3400 = sst [smem:[#allocation7_spill]] %s3374_s5 }
   0x6   :  { %3401 = sst [smem:[#allocation8_spill]] %s3375_s7 }
   0x7   :  { %s3402_s26 = sld [smem:[#allocation3_spill]] }
   0x8   :  { %s3403_s28 = sld [smem:[#allocation4_spill]] }
   0x9   :  { %s3404_s7 = sld [smem:[#allocation5_spill]] }
   0xa   :  { %s3405_s0 = sld [smem:[#allocation6_spill]] }
   0xb   :  { %s3407_s22 = sld [smem:[#allocation8_spill]] }
   0xd   :  { %v78_v0 = vld [vmem:[%s3402_s26] sm:$0xff]  ;;  %s3406_s26 = sld [smem:[#allocation7_spill]] }
   0xe   :  { %v74_v1 = vld [vmem:[%s3403_s28 + $0x20] sm:$0xff]  ;;  %v75_v2 = vld [vmem:[%s3403_s28 + $0x28] sm:$0xff]  ;;  %2631 = vmatprep.subr.mxu1 %v78_v0  ;;  %v76_v4 = vld [vmem:[%s3403_s28 + $0x30] sm:$0xff]  ;;  %2400 = vmatprep.subr.mxu0 %v78_v0 }
   0xf   :  { %2408 = vmatprep.mubr.msk.f32.mxu1 %vm86_vm0, %v74_v1  ;;  %v2860_v3 = vld [vmem:[%s3404_s7 + $0x18] sm:$0xff]  ;;  %2632 = vmatpush3.msra.mxu1 %v78_v0  ;;  %v2870_v6 = vld [vmem:[%s3404_s7 + $0x10] sm:$0xff]  ;;  %v70_v7 = vld [vmem:[%s3403_s28] sm:$0xff] }
  0x10   :  { %2409 = vmatmul.mubr.msk.f32.vlgmr.msra.gmra.mxu1 %vm86_vm0, %v75_v2  ;;  %2414 = vmatprep.subr.mxu1 %v2732_v5  ;;  %v77_v8 = vld [vmem:[%s3403_s28 + $0x38] sm:$0xff]  ;;  %v2884_v9 = vld [vmem:[%s3404_s7 + $0x8] sm:$0xff]  ;;  %v2896_v11 = vld [vmem:[%s3404_s7] sm:$0xff] }
  0x11   :  { %2415 = vmatpush3.msra.mxu1 %v2860_v3  ;;  %2411 = vmatprep.mubr.msk.f32.mxu1 %vm86_vm0, %v76_v4  ;;  %v71_v10 = vld [vmem:[%s3403_s28 + $0x8] sm:$0xff]  ;;  %v2936_v16 = vld [vmem:[%s3405_s0] ss:$0 sm:$0xff]  ;;  %v72_v53 = vld [vmem:[%s3403_s28 + $0x10] sm:$0xff] }
  0x12   :  { %2416 = vmatprep.subr.mxu1 %v2732_v5  ;;  %2401 = vmatpush3.msra.mxu0 %v78_v0  ;;  %v73_v54 = vld [vmem:[%s3403_s28 + $0x18] sm:$0xff] }
  0x13   :  { %2417 = vmatpush3.msra.mxu1 %v2870_v6  ;;  %2402 = vmatprep.mubr.msk.f32.mxu0 %vm86_vm0, %v70_v7  ;;  %v2943_v22 = vld [vmem:[%s3406_s26] ss:$0 sm:$0xff] }
  0x14   :  { %2412 = vmatmul.mubr.msk.f32.gmra.mxu1 %vm86_vm0, %v77_v8  ;;  %2418 = vmatprep.subr.mxu1 %v2732_v5 }
  0x15   :  { %2419 = vmatpush3.msra.mxu1 %v2884_v9  ;;  %2403 = vmatmul.mubr.msk.f32.vlgmr.msra.gmra.mxu0 %vm86_vm0, %v71_v10 }
  0x16   :  { %2420 = vmatprep.subr.mxu1 %v2732_v5  ;;  %2422 = vmatprep.mubr.msk.f32.mxu1 %vm2733_vm1, %v2732_v5 }
  0x17   :  { %2421 = vmatpush3.msra.mxu1 %v2896_v11  ;;  %2436 = vmatprep.subr.mxu0 %v2732_v5 }
  0x18   :  { %2423 = vmatmul.mubr.f32.vlgmr.msra.gmra.mxu1 %v2732_v5  ;;  %2425 = vmatprep.subr.mxu1 %v2732_v5 }
  0x19   :  { %2426 = vmatpush3.msra.mxu1 %v2860_v3  ;;  %2433 = vmatprep.mubr.msk.f32.mxu1 %vm2733_vm1, %v2732_v5 }
  0x1a   :  { %2427 = vmatprep.subr.mxu1 %v2732_v5  ;;  %2437 = vmatpush3.msra.mxu0 %v2860_v3 }
  0x1b   :  { %2428 = vmatpush3.msra.mxu1 %v2870_v6  ;;  %2438 = vmatprep.subr.mxu0 %v2732_v5 }
  0x1c   :  { %2429 = vmatprep.subr.mxu1 %v2732_v5  ;;  %2439 = vmatpush3.msra.mxu0 %v2870_v6 }
  0x1d   :  { %2430 = vmatpush3.msra.mxu1 %v2884_v9  ;;  %2440 = vmatprep.subr.mxu0 %v2732_v5 }
  0x1e   :  { %2431 = vmatprep.subr.mxu1 %v2732_v5  ;;  %2441 = vmatpush3.msra.mxu0 %v2884_v9 }
  0x1f   :  { %2432 = vmatpush3.msra.mxu1 %v2896_v11  ;;  %2442 = vmatprep.subr.mxu0 %v2732_v5 }
  0x20   :  { %2443 = vmatpush3.msra.mxu0 %v2896_v11  ;;  %2447 = vmatprep.subr.mxu1 %v2732_v5 }
  0x21   :  { %2458 = vmatprep.subr.mxu0 %v2732_v5  ;;  %2405 = vmatprep.mubr.msk.f32.mxu0 %vm86_vm0, %v72_v53 }
  0x22   :  { %2406 = vmatmul.mubr.msk.f32.gmra.mxu0 %vm86_vm0, %v73_v54 }
  0x23   :  { %2444 = vmatprep.mubr.msk.f32.mxu0 %vm2733_vm1, %v2732_v5 }
  0xd0   :  { %v2925_v12 = vpop.f32.mrf.mxu1 }
  0xd2   :  { %v2927_v13 = vpop.f32.mrf.mxu1 }
  0xd3   :  { %v198_v54 = vadd.f32 %v2943_v22, %v2927_v13 }
  0xd4   :  { %v2929_v14 = vpop.f32.mrf.mxu1 }
  0xd5   :  { %v2404_v20 = vpop.f32.mrf.mxu0 }
  0xd6   :  { %v2931_v15 = vpop.f32.mrf.mxu1  ;;  %v183_v43 = vadd.f32 %v2404_v20, %v2943_v22 }
  0xd7   :  { %v177_v21 = vpop.f32.mrf.mxu0 }
  0xd8   :  { %v297_v17 = vpop.f32.mrf.mxu1  ;;  %v178_v23 = vadd.f32 %v2943_v22, %v177_v21 }
  0xd9   :  { %v298_v18 = vadd.f32 %v2936_v16, %v297_v17 }
  0xda   :  { %v2424_v19 = vpop.f32.mrf.mxu1 }
  0xdb   :  { %309 = vrot.lane.b32.xlu0 %v298_v18, %s2734_s24  ;;  %v301_v24 = vadd.f32 %v298_v18, %v178_v23 }
  0xdd   :  { %v2248_v25 = vmul.f32 -1.442695, %v301_v24 }
  0xdf   :  { %2640 = vpow2.f32 %v2248_v25 }
  0xe2   :  { %v2407_v62 = vpop.f32.mrf.mxu0 }
  0xe4   :  { %v187_v63 = vpop.f32.mrf.mxu0 }
  0xe5   :  { %v188_v4 = vadd.f32 %v2943_v22, %v187_v63 }
  0xec   :  { %v2641_v26 = vpop.eup %2640 }
  0xed   :  { %v305_v27 = vadd.f32 1.0, %v2641_v26 }
  0xef   :  { %2642 = vrcp.f32 %v305_v27 }
  0xfc   :  { %v2643_v28 = vpop.eup %2642 }
  0xfd   :  { %v319_v34 = vsub.f32 1.0, %v2643_v28  ;;  %v325_v36 = vmul.f32 0.0, %v2643_v28 }
 0x14d   :  { %v310_v29 = vpop.permute.xlu0 %309 }
 0x14e   :  { %v312_v30 = vmul.f32 %v2643_v28, %v310_v29 }
 0x150   :  { %314 = vrot.lane.b32.xlu0 %v312_v30, %s2734_s24 }
 0x1c2   :  { %v315_v31 = vpop.permute.xlu0 %314 }
 0x1c3   :  { %v317_v32 = vadd.f32 %v315_v31, %v178_v23 }
 0x1c5   :  { %2644 = vtanh.f32 %v317_v32 }
 0x1d2   :  { %v2645_v33 = vpop.eup %2644 }
 0x1d3   :  { %321 = vrot.lane.b32.xlu1 %v2645_v33, %s2735_s27 }
 0x245   :  { %v322_v35 = vpop.permute.xlu1 %321 }
 0x246   :  { %v324_v37 = vmul.f32 %v322_v35, %v319_v34  ;;  %v193_v34 = vadd.f32 %v2407_v62, %v2943_v22 }
 0x248   :  { %v326_v38 = vadd.f32 %v325_v36, %v324_v37 }
 0x24a   :  { %328 = vrot.lane.b32.xlu1 %v326_v38, %s2735_s27 }
 0x2bc   :  { %v329_v39 = vpop.permute.xlu1 %328 }
 0x2bd   :  { %2434 = vmatmul.mubr.msk.f32.vlgmr.msra.gmra.mxu1 %vm227_vm2, %v329_v39 }
 0x2be   :  { %2448 = vmatpush3.msra.mxu1 %v2860_v3  ;;  %2455 = vmatprep.mubr.msk.f32.mxu1 %vm2733_vm1, %v2732_v5 }
 0x2bf   :  { %2449 = vmatprep.subr.mxu1 %v2732_v5 }
 0x2c0   :  { %2450 = vmatpush3.msra.mxu1 %v2870_v6 }
 0x2c1   :  { %2451 = vmatprep.subr.mxu1 %v2732_v5 }
 0x2c2   :  { %2452 = vmatpush3.msra.mxu1 %v2884_v9 }
 0x2c3   :  { %2453 = vmatprep.subr.mxu1 %v2732_v5 }
 0x2c4   :  { %2454 = vmatpush3.msra.mxu1 %v2896_v11 }
 0x2c5   :  { %2469 = vmatprep.subr.mxu1 %v2732_v5 }
 0x37d   :  { %v398_v40 = vpop.f32.mrf.mxu1 }
 0x37e   :  { %v399_v41 = vadd.f32 %v2936_v16, %v398_v40 }
 0x37f   :  { %v2435_v42 = vpop.f32.mrf.mxu1 }
 0x380   :  { %410 = vrot.lane.b32.xlu0 %v399_v41, %s2734_s24  ;;  %v402_v44 = vadd.f32 %v399_v41, %v183_v43 }
 0x382   :  { %v2250_v45 = vmul.f32 -1.442695, %v402_v44 }
 0x384   :  { %2646 = vpow2.f32 %v2250_v45 }
 0x391   :  { %v2647_v46 = vpop.eup %2646 }
 0x392   :  { %v406_v47 = vadd.f32 1.0, %v2647_v46 }
 0x394   :  { %2648 = vrcp.f32 %v406_v47 }
 0x3a1   :  { %v2649_v48 = vpop.eup %2648 }
 0x3a2   :  { %v420_v56 = vsub.f32 1.0, %v2649_v48  ;;  %v426_v58 = vmul.f32 %v2649_v48, %v326_v38 }
 0x3f2   :  { %v411_v49 = vpop.permute.xlu0 %410 }
 0x3f3   :  { %v413_v50 = vmul.f32 %v2649_v48, %v411_v49 }
 0x3f5   :  { %415 = vrot.lane.b32.xlu1 %v413_v50, %s2734_s24 }
 0x467   :  { %v416_v51 = vpop.permute.xlu1 %415 }
 0x468   :  { %v418_v52 = vadd.f32 %v416_v51, %v183_v43 }
 0x46a   :  { %2650 = vtanh.f32 %v418_v52 }
 0x477   :  { %v2651_v55 = vpop.eup %2650 }
 0x478   :  { %422 = vrot.lane.b32.xlu0 %v2651_v55, %s2735_s27 }
 0x4ea   :  { %v423_v57 = vpop.permute.xlu0 %422 }
 0x4eb   :  { %v425_v59 = vmul.f32 %v423_v57, %v420_v56 }
 0x4ed   :  { %v427_v60 = vadd.f32 %v426_v58, %v425_v59 }
 0x4ef   :  { %429 = vrot.lane.b32.xlu1 %v427_v60, %s2735_s27 }
 0x561   :  { %v430_v61 = vpop.permute.xlu1 %429 }
 0x562   :  { %2445 = vmatmul.mubr.msk.f32.vlgmr.msra.gmra.mxu0 %vm227_vm2, %v430_v61 }
 0x563   :  { %2459 = vmatpush3.msra.mxu0 %v2860_v3  ;;  %2466 = vmatprep.mubr.msk.f32.mxu0 %vm2733_vm1, %v2732_v5 }
 0x564   :  { %2460 = vmatprep.subr.mxu0 %v2732_v5 }
 0x565   :  { %2461 = vmatpush3.msra.mxu0 %v2870_v6 }
 0x566   :  { %2462 = vmatprep.subr.mxu0 %v2732_v5 }
 0x567   :  { %2463 = vmatpush3.msra.mxu0 %v2884_v9 }
 0x568   :  { %2464 = vmatprep.subr.mxu0 %v2732_v5 }
 0x569   :  { %2465 = vmatpush3.msra.mxu0 %v2896_v11 }
 0x56a   :  { %2480 = vmatprep.subr.mxu0 %v2732_v5 }
 0x622   :  { %v499_v0 = vpop.f32.mrf.mxu0 }
 0x623   :  { %v500_v1 = vadd.f32 %v2936_v16, %v499_v0 }
 0x624   :  { %v2446_v2 = vpop.f32.mrf.mxu0 }
 0x625   :  { %511 = vrot.lane.b32.xlu0 %v500_v1, %s2734_s24  ;;  %v503_v7 = vadd.f32 %v500_v1, %v188_v4 }
 0x627   :  { %v2252_v8 = vmul.f32 -1.442695, %v503_v7 }
 0x629   :  { %2652 = vpow2.f32 %v2252_v8 }
 0x636   :  { %v2653_v10 = vpop.eup %2652 }
 0x637   :  { %v507_v17 = vadd.f32 1.0, %v2653_v10 }
 0x639   :  { %2654 = vrcp.f32 %v507_v17 }
 0x646   :  { %v2655_v18 = vpop.eup %2654 }
 0x647   :  { %v521_v25 = vsub.f32 1.0, %v2655_v18  ;;  %v527_v27 = vmul.f32 %v2655_v18, %v427_v60 }
 0x697   :  { %v512_v19 = vpop.permute.xlu0 %511 }
 0x698   :  { %v514_v20 = vmul.f32 %v2655_v18, %v512_v19  ;;  %v203_v18 = vadd.f32 %v2925_v12, %v2943_v22  ;;  %v1038_v12 = vld [vmem:[%s3407_s22] sm:$0xff] }
 0x69a   :  { %516 = vrot.lane.b32.xlu1 %v514_v20, %s2734_s24 }
 0x70c   :  { %v517_v21 = vpop.permute.xlu1 %516 }
 0x70d   :  { %v519_v23 = vadd.f32 %v517_v21, %v188_v4 }
 0x70f   :  { %2656 = vtanh.f32 %v519_v23 }
 0x71c   :  { %v2657_v24 = vpop.eup %2656 }
 0x71d   :  { %523 = vrot.lane.b32.xlu0 %v2657_v24, %s2735_s27 }
 0x78f   :  { %v524_v26 = vpop.permute.xlu0 %523 }
 0x790   :  { %v526_v28 = vmul.f32 %v524_v26, %v521_v25 }
 0x792   :  { %v528_v29 = vadd.f32 %v527_v27, %v526_v28 }
 0x794   :  { %530 = vrot.lane.b32.xlu1 %v528_v29, %s2735_s27 }
 0x806   :  { %v531_v30 = vpop.permute.xlu1 %530 }
 0x807   :  { %2456 = vmatmul.mubr.msk.f32.vlgmr.msra.gmra.mxu1 %vm227_vm2, %v531_v30 }
 0x808   :  { %2470 = vmatpush3.msra.mxu1 %v2860_v3  ;;  %2477 = vmatprep.mubr.msk.f32.mxu1 %vm2733_vm1, %v2732_v5 }
 0x809   :  { %2471 = vmatprep.subr.mxu1 %v2732_v5 }
 0x80a   :  { %2472 = vmatpush3.msra.mxu1 %v2870_v6 }
 0x80b   :  { %2473 = vmatprep.subr.mxu1 %v2732_v5 }
 0x80c   :  { %2474 = vmatpush3.msra.mxu1 %v2884_v9 }
 0x80d   :  { %2475 = vmatprep.subr.mxu1 %v2732_v5 }
 0x80e   :  { %2476 = vmatpush3.msra.mxu1 %v2896_v11 }
 0x80f   :  { %2491 = vmatprep.subr.mxu1 %v2732_v5 }
 0x8c7   :  { %v600_v31 = vpop.f32.mrf.mxu1 }
 0x8c8   :  { %v601_v32 = vadd.f32 %v2936_v16, %v600_v31 }
 0x8c9   :  { %v2457_v33 = vpop.f32.mrf.mxu1 }
 0x8ca   :  { %612 = vrot.lane.b32.xlu0 %v601_v32, %s2734_s24  ;;  %v604_v35 = vadd.f32 %v601_v32, %v193_v34  ;;  %v1034_v32 = vld [vmem:[%s3376_s1] sm:$0xff] }
 0x8cc   :  { %v2254_v36 = vmul.f32 -1.442695, %v604_v35  ;;  %v3063_v35 = vld [vmem:[%s3377_s8 + $0x18] sm:$0xff] }
 0x8ce   :  { %2658 = vpow2.f32 %v2254_v36  ;;  %v1036_v36 = vld [vmem:[%s3376_s1 + $0x10] sm:$0xff] }
 0x8db   :  { %v2659_v37 = vpop.eup %2658 }
 0x8dc   :  { %v608_v38 = vadd.f32 1.0, %v2659_v37  ;;  %v3072_v37 = vld [vmem:[%s3377_s8 + $0x10] sm:$0xff] }
 0x8de   :  { %2660 = vrcp.f32 %v608_v38  ;;  %v1037_v38 = vld [vmem:[%s3376_s1 + $0x18] sm:$0xff] }
 0x8eb   :  { %v2661_v39 = vpop.eup %2660 }
 0x8ec   :  { %v622_v45 = vsub.f32 1.0, %v2661_v39  ;;  %v628_v47 = vmul.f32 %v2661_v39, %v528_v29 }
 0x93c   :  { %v613_v40 = vpop.permute.xlu0 %612 }
 0x93d   :  { %v615_v41 = vmul.f32 %v2661_v39, %v613_v40  ;;  %v3083_v39 = vld [vmem:[%s3377_s8 + $0x8] sm:$0xff]  ;;  %v3091_v40 = vld [vmem:[%s3377_s8] sm:$0xff] }
 0x93f   :  { %617 = vrot.lane.b32.xlu1 %v615_v41, %s2734_s24 }
 0x9b1   :  { %v618_v42 = vpop.permute.xlu1 %617 }
 0x9b2   :  { %v620_v43 = vadd.f32 %v618_v42, %v193_v34  ;;  %v1035_v34 = vld [vmem:[%s3376_s1 + $0x8] sm:$0xff] }
 0x9b4   :  { %2662 = vtanh.f32 %v620_v43 }
 0x9c1   :  { %v2663_v44 = vpop.eup %2662 }
 0x9c2   :  { %624 = vrot.lane.b32.xlu0 %v2663_v44, %s2735_s27  ;;  %v2263_v44 = vld [vmem:[%s3378_s9] ss:$0 sm:$0xff] }
 0xa34   :  { %v625_v46 = vpop.permute.xlu0 %624 }
 0xa35   :  { %v627_v48 = vmul.f32 %v625_v46, %v622_v45 }
 0xa37   :  { %v629_v49 = vadd.f32 %v628_v47, %v627_v48 }
 0xa39   :  { %631 = vrot.lane.b32.xlu1 %v629_v49, %s2735_s27 }
 0xaab   :  { %v632_v50 = vpop.permute.xlu1 %631 }
 0xaac   :  { %2467 = vmatmul.mubr.msk.f32.vlgmr.msra.gmra.mxu0 %vm227_vm2, %v632_v50 }
 0xaad   :  { %2481 = vmatpush3.msra.mxu0 %v2860_v3  ;;  %2488 = vmatprep.mubr.msk.f32.mxu0 %vm2733_vm1, %v2732_v5 }
 0xaae   :  { %2482 = vmatprep.subr.mxu0 %v2732_v5 }
 0xaaf   :  { %2483 = vmatpush3.msra.mxu0 %v2870_v6 }
 0xab0   :  { %2484 = vmatprep.subr.mxu0 %v2732_v5 }
 0xab1   :  { %2485 = vmatpush3.msra.mxu0 %v2884_v9 }
 0xab2   :  { %2486 = vmatprep.subr.mxu0 %v2732_v5 }
 0xab3   :  { %2487 = vmatpush3.msra.mxu0 %v2896_v11 }
 0xab4   :  { %2502 = vmatprep.subr.mxu0 %v1038_v12 }
 0xb6c   :  { %v701_v51 = vpop.f32.mrf.mxu0 }
 0xb6d   :  { %v702_v52 = vadd.f32 %v2936_v16, %v701_v51  ;;  %v3122_v51 = vld [vmem:[%s3379_s10] ss:$0 sm:$0xff] }
 0xb6e   :  { %v2468_v53 = vpop.f32.mrf.mxu0 }
 0xb6f   :  { %713 = vrot.lane.b32.xlu0 %v702_v52, %s2734_s24  ;;  %v705_v55 = vadd.f32 %v702_v52, %v198_v54 }
 0xb71   :  { %v2256_v56 = vmul.f32 -1.442695, %v705_v55  ;;  %v208_v55 = vadd.f32 %v2943_v22, %v2931_v15 }
 0xb73   :  { %2664 = vpow2.f32 %v2256_v56 }
 0xb80   :  { %v2665_v57 = vpop.eup %2664 }
 0xb81   :  { %v709_v58 = vadd.f32 1.0, %v2665_v57 }
 0xb83   :  { %2666 = vrcp.f32 %v709_v58 }
 0xb90   :  { %v2667_v59 = vpop.eup %2666 }
 0xb91   :  { %v723_v1 = vsub.f32 1.0, %v2667_v59  ;;  %v729_v13 = vmul.f32 %v2667_v59, %v629_v49 }
 0xbe1   :  { %v714_v60 = vpop.permute.xlu0 %713 }
 0xbe2   :  { %v716_v61 = vmul.f32 %v2667_v59, %v714_v60 }
 0xbe4   :  { %718 = vrot.lane.b32.xlu1 %v716_v61, %s2734_s24 }
 0xc56   :  { %v719_v62 = vpop.permute.xlu1 %718 }
 0xc57   :  { %v721_v63 = vadd.f32 %v719_v62, %v198_v54 }
 0xc59   :  { %2668 = vtanh.f32 %v721_v63 }
 0xc66   :  { %v2669_v0 = vpop.eup %2668 }
 0xc67   :  { %725 = vrot.lane.b32.xlu0 %v2669_v0, %s2735_s27 }
 0xcd9   :  { %v726_v2 = vpop.permute.xlu0 %725 }
 0xcda   :  { %v728_v4 = vmul.f32 %v726_v2, %v723_v1 }
 0xcdc   :  { %v730_v7 = vadd.f32 %v729_v13, %v728_v4 }
 0xcde   :  { %732 = vrot.lane.b32.xlu1 %v730_v7, %s2735_s27 }
 0xd50   :  { %v733_v8 = vpop.permute.xlu1 %732 }
 0xd51   :  { %2478 = vmatmul.mubr.msk.f32.vlgmr.msra.gmra.mxu1 %vm227_vm2, %v733_v8 }
 0xd52   :  { %2492 = vmatpush3.msra.mxu1 %v2860_v3  ;;  %2499 = vmatprep.mubr.msk.f32.mxu1 %vm2733_vm1, %v2732_v5 }
 0xd53   :  { %2493 = vmatprep.subr.mxu1 %v2732_v5 }
 0xd54   :  { %2494 = vmatpush3.msra.mxu1 %v2870_v6 }
 0xd55   :  { %2495 = vmatprep.subr.mxu1 %v2732_v5 }
 0xd56   :  { %2496 = vmatpush3.msra.mxu1 %v2884_v9 }
 0xd57   :  { %2497 = vmatprep.subr.mxu1 %v2732_v5 }
 0xd58   :  { %2498 = vmatpush3.msra.mxu1 %v2896_v11 }
 0xd59   :  { %2521 = vmatprep.subr.mxu1 %v2732_v5 }
 0xe11   :  { %v802_v10 = vpop.f32.mrf.mxu1 }
 0xe12   :  { %v803_v3 = vadd.f32 %v2936_v16, %v802_v10 }
 0xe13   :  { %v2479_v17 = vpop.f32.mrf.mxu1 }
 0xe14   :  { %814 = vrot.lane.b32.xlu0 %v803_v3, %s2734_s24  ;;  %v806_v6 = vadd.f32 %v803_v3, %v203_v18 }
 0xe16   :  { %v2258_v19 = vmul.f32 -1.442695, %v806_v6 }
 0xe18   :  { %2670 = vpow2.f32 %v2258_v19 }
 0xe25   :  { %v2671_v20 = vpop.eup %2670 }
 0xe26   :  { %v810_v9 = vadd.f32 1.0, %v2671_v20 }
 0xe28   :  { %2672 = vrcp.f32 %v810_v9 }
 0xe35   :  { %v2673_v21 = vpop.eup %2672 }
 0xe36   :  { %v824_v27 = vsub.f32 1.0, %v2673_v21  ;;  %v830_v29 = vmul.f32 %v2673_v21, %v730_v7 }
 0xe86   :  { %v815_v23 = vpop.permute.xlu0 %814 }
 0xe87   :  { %v817_v11 = vmul.f32 %v2673_v21, %v815_v23 }
 0xe89   :  { %819 = vrot.lane.b32.xlu1 %v817_v11, %s2734_s24 }
 0xefb   :  { %v820_v24 = vpop.permute.xlu1 %819 }
 0xefc   :  { %v822_v25 = vadd.f32 %v820_v24, %v203_v18 }
 0xefe   :  { %2674 = vtanh.f32 %v822_v25 }
 0xf0b   :  { %v2675_v26 = vpop.eup %2674 }
 0xf0c   :  { %826 = vrot.lane.b32.xlu0 %v2675_v26, %s2735_s27 }
 0xf7e   :  { %v827_v28 = vpop.permute.xlu0 %826 }
 0xf7f   :  { %v829_v30 = vmul.f32 %v827_v28, %v824_v27 }
 0xf81   :  { %v3047_v31 = vadd.f32 %v830_v29, %v829_v30 }
 0xf83   :  { %833 = vrot.lane.b32.xlu1 %v3047_v31, %s2735_s27 }
 0xff5   :  { %v834_v33 = vpop.permute.xlu1 %833 }
 0xff6   :  { %2489 = vmatmul.mubr.msk.f32.vlgmr.msra.gmra.mxu0 %vm227_vm2, %v834_v33 }
 0xff7   :  { %2503 = vmatpush3.msra.mxu0 %v1038_v12  ;;  %2504 = vmatprep.mubr.msk.f32.mxu0 %vm86_vm0, %v1034_v32 }
 0xff8   :  { %2510 = vmatprep.subr.mxu0 %v2732_v5 }
 0xffa   :  { %2505 = vmatmul.mubr.msk.f32.vlgmr.msra.gmra.mxu0 %vm86_vm0, %v1035_v34 }
 0xffb   :  { %2511 = vmatpush3.msra.mxu0 %v3063_v35  ;;  %2507 = vmatprep.mubr.msk.f32.mxu0 %vm86_vm0, %v1036_v36 }
 0xffc   :  { %2512 = vmatprep.subr.mxu0 %v2732_v5 }
 0xffd   :  { %2513 = vmatpush3.msra.mxu0 %v3072_v37 }
 0xffe   :  { %2508 = vmatmul.mubr.msk.f32.gmra.mxu0 %vm86_vm0, %v1037_v38  ;;  %2514 = vmatprep.subr.mxu0 %v2732_v5 }
 0xfff   :  { %2515 = vmatpush3.msra.mxu0 %v3083_v39  ;;  %2518 = vmatprep.mubr.msk.f32.mxu0 %vm2733_vm1, %v2732_v5 }
0x1000   :  { %2516 = vmatprep.subr.mxu0 %v2732_v5 }
0x1001   :  { %2517 = vmatpush3.msra.mxu0 %v3091_v40 }
0x1002   :  { %2519 = vmatmul.mubr.f32.vlgmr.msra.gmra.mxu0 %v2732_v5  ;;  %2532 = vmatprep.subr.mxu0 %v2732_v5 }
0x1003   :  { %2533 = vmatpush3.msra.mxu0 %v3063_v35  ;;  %2540 = vmatprep.mubr.msk.f32.mxu0 %vm2733_vm1, %v2732_v5 }
0x1004   :  { %2534 = vmatprep.subr.mxu0 %v2732_v5 }
0x1005   :  { %2535 = vmatpush3.msra.mxu0 %v3072_v37 }
0x1006   :  { %2536 = vmatprep.subr.mxu0 %v2732_v5 }
0x1007   :  { %2537 = vmatpush3.msra.mxu0 %v3083_v39 }
0x1008   :  { %2538 = vmatprep.subr.mxu0 %v2732_v5 }
0x1009   :  { %2539 = vmatpush3.msra.mxu0 %v3091_v40 }
0x100a   :  { %2554 = vmatprep.subr.mxu0 %v2732_v5 }
0x10b6   :  { %v903_v41 = vpop.f32.mrf.mxu0 }
0x10b7   :  { %v904_v42 = vadd.f32 %v2936_v16, %v903_v41 }
0x10b8   :  { %v2490_v43 = vpop.f32.mrf.mxu0 }
0x10b9   :  { %915 = vrot.lane.b32.xlu0 %v904_v42, %s2734_s24  ;;  %v907_v56 = vadd.f32 %v904_v42, %v208_v55 }
0x10ba   :  { %v2506_v45 = vpop.f32.mrf.mxu0 }
0x10bb   :  { %v3115_v46 = vadd.f32 %v2506_v45, %v2263_v44  ;;  %v2260_v57 = vmul.f32 -1.442695, %v907_v56 }
0x10bc   :  { %v1124_v47 = vpop.f32.mrf.mxu0 }
0x10bd   :  { %2676 = vpow2.f32 %v2260_v57  ;;  %v1125_v58 = vadd.f32 %v2263_v44, %v1124_v47 }
0x10be   :  { %v2509_v48 = vpop.f32.mrf.mxu0 }
0x10bf   :  { %v3117_v49 = vadd.f32 %v2509_v48, %v2263_v44 }
0x10c0   :  { %v1134_v50 = vpop.f32.mrf.mxu0 }
0x10c1   :  { %v3124_v16 = vadd.f32 %v2263_v44, %v1134_v50 }
0x10c2   :  { %v1220_v52 = vpop.f32.mrf.mxu0 }
0x10c3   :  { %v1221_v53 = vadd.f32 %v3122_v51, %v1220_v52 }
0x10c4   :  { %v2520_v54 = vpop.f32.mrf.mxu0 }
0x10c5   :  { %1232 = vrot.lane.b32.xlu1 %v1221_v53, %s2734_s24  ;;  %v1224_v59 = vadd.f32 %v1221_v53, %v1125_v58 }
0x10c7   :  { %v2269_v60 = vmul.f32 -1.442695, %v1224_v59 }
0x10c9   :  { %2678 = vpow2.f32 %v2269_v60 }
0x10ca   :  { %v2677_v61 = vpop.eup %2676 }
0x10cb   :  { %v911_v62 = vadd.f32 1.0, %v2677_v61 }
0x10cd   :  { %2680 = vrcp.f32 %v911_v62 }
0x10d6   :  { %v2679_v63 = vpop.eup %2678 }
0x10d7   :  { %v1228_v0 = vadd.f32 1.0, %v2679_v63 }
0x10d9   :  { %2682 = vrcp.f32 %v1228_v0  ;;  %v1556_v0 = vld [vmem:[%s3381_s11] sm:$0xff] }
0x10da   :  { %v2681_v1 = vpop.eup %2680 }
0x10db   :  { %v925_v6 = vsub.f32 1.0, %v2681_v1  ;;  %v931_v20 = vmul.f32 %v2681_v1, %v3047_v31 }
0x10e6   :  { %v2683_v4 = vpop.eup %2682 }
0x10e7   :  { %v1242_v23 = vsub.f32 1.0, %v2683_v4  ;;  %v1248_v24 = vmul.f32 0.0, %v2683_v4 }
0x112b   :  { %v916_v2 = vpop.permute.xlu0 %915 }
0x112c   :  { %v918_v13 = vmul.f32 %v2681_v1, %v916_v2  ;;  %v1553_v2 = vld [vmem:[%s3382_s2] sm:$0xff] }
0x112e   :  { %920 = vrot.lane.b32.xlu0 %v918_v13, %s2734_s24 }
0x1137   :  { %v1233_v15 = vpop.permute.xlu1 %1232 }
0x1138   :  { %v1235_v22 = vmul.f32 %v2683_v4, %v1233_v15  ;;  %v1656_v4 = vld [vmem:[%s3380_s12 + $0x18] sm:$0xff] }
0x113a   :  { %1237 = vrot.lane.b32.xlu1 %v1235_v22, %s2734_s24  ;;  %v1655_v22 = vld [vmem:[%s3380_s12 + $0x10] sm:$0xff] }
0x11a0   :  { %v921_v7 = vpop.permute.xlu0 %920 }
0x11a1   :  { %v923_v8 = vadd.f32 %v921_v7, %v208_v55 }
0x11a3   :  { %2684 = vtanh.f32 %v923_v8  ;;  %v1654_v8 = vld [vmem:[%s3380_s12 + $0x8] sm:$0xff] }
0x11ac   :  { %v1238_v10 = vpop.permute.xlu1 %1237 }
0x11ad   :  { %v1240_v3 = vadd.f32 %v1238_v10, %v1125_v58  ;;  %v1653_v10 = vld [vmem:[%s3380_s12] sm:$0xff] }
0x11af   :  { %2686 = vtanh.f32 %v1240_v3 }
0x11b0   :  { %v2685_v17 = vpop.eup %2684 }
0x11b1   :  { %927 = vrot.lane.b32.xlu0 %v2685_v17, %s2735_s27 }
0x11bc   :  { %v2687_v18 = vpop.eup %2686 }
0x11bd   :  { %1244 = vrot.lane.b32.xlu1 %v2687_v18, %s2735_s27 }
0x1223   :  { %v928_v19 = vpop.permute.xlu0 %927 }
0x1224   :  { %v930_v9 = vmul.f32 %v928_v19, %v925_v6 }
0x1226   :  { %v3135_v21 = vadd.f32 %v931_v20, %v930_v9  ;;  %v3229_v20 = vld [vmem:[%s3383_s14] ss:$0 sm:$0xff] }
0x1228   :  { %934 = vrot.lane.b32.xlu0 %v3135_v21, %s2735_s27 }
0x122f   :  { %v1245_v11 = vpop.permute.xlu1 %1244 }
0x1230   :  { %v1247_v25 = vmul.f32 %v1245_v11, %v1242_v23 }
0x1232   :  { %v1249_v26 = vadd.f32 %v1248_v24, %v1247_v25  ;;  %v3236_v24 = vld [vmem:[%s3384_s13] ss:$0 sm:$0xff] }
0x1234   :  { %1251 = vrot.lane.b32.xlu1 %v1249_v26, %s2735_s27 }
0x129a   :  { %v935_v12 = vpop.permute.xlu0 %934 }
0x129b   :  { %2500 = vmatmul.mubr.msk.f32.vlgmr.msra.gmra.mxu1 %vm227_vm2, %v935_v12 }
0x129c   :  { %2522 = vmatpush3.msra.mxu1 %v3063_v35  ;;  %2529 = vmatprep.mubr.msk.f32.mxu1 %vm2733_vm1, %v2732_v5 }
0x129d   :  { %2523 = vmatprep.subr.mxu1 %v2732_v5 }
0x129e   :  { %2524 = vmatpush3.msra.mxu1 %v3072_v37 }
0x129f   :  { %2525 = vmatprep.subr.mxu1 %v2732_v5 }
0x12a0   :  { %2526 = vmatpush3.msra.mxu1 %v3083_v39 }
0x12a1   :  { %2527 = vmatprep.subr.mxu1 %v2732_v5 }
0x12a2   :  { %2528 = vmatpush3.msra.mxu1 %v3091_v40 }
0x12a3   :  { %2543 = vmatprep.subr.mxu1 %v2732_v5 }
0x12a6   :  { %v1252_v27 = vpop.permute.xlu1 %1251 }
0x12a7   :  { %2530 = vmatmul.mubr.msk.f32.vlgmr.msra.gmra.mxu1 %vm227_vm2, %v1252_v27 }
0x12a8   :  { %2544 = vmatpush3.msra.mxu1 %v3063_v35  ;;  %2551 = vmatprep.mubr.msk.f32.mxu1 %vm2733_vm1, %v2732_v5 }
0x12a9   :  { %2545 = vmatprep.subr.mxu1 %v2732_v5 }
0x12aa   :  { %2546 = vmatpush3.msra.mxu1 %v3072_v37 }
0x12ab   :  { %2547 = vmatprep.subr.mxu1 %v2732_v5 }
0x12ac   :  { %2548 = vmatpush3.msra.mxu1 %v3083_v39 }
0x12ad   :  { %2549 = vmatprep.subr.mxu1 %v2732_v5 }
0x12ae   :  { %2550 = vmatpush3.msra.mxu1 %v3091_v40 }
0x12af   :  { %2565 = vmatprep.subr.mxu1 %v2732_v5 }
0x135b   :  { %v3162_v28 = vpop.f32.mrf.mxu1 }
0x135d   :  { %v2501_v29 = vpop.f32.mrf.mxu1 }
0x1367   :  { %v1321_v30 = vpop.f32.mrf.mxu1 }
0x1368   :  { %v1322_v31 = vadd.f32 %v3122_v51, %v1321_v30 }
0x1369   :  { %v2531_v32 = vpop.f32.mrf.mxu1 }
0x136a   :  { %1333 = vrot.lane.b32.xlu0 %v1322_v31, %s2734_s24  ;;  %v1325_v33 = vadd.f32 %v1322_v31, %v3115_v46 }
0x136c   :  { %v2271_v34 = vmul.f32 -1.442695, %v1325_v33 }
0x136e   :  { %2688 = vpow2.f32 %v2271_v34 }
0x137b   :  { %v2689_v35 = vpop.eup %2688 }
0x137c   :  { %v1329_v36 = vadd.f32 1.0, %v2689_v35  ;;  %v1554_v35 = vld [vmem:[%s3382_s2 + $0x8] sm:$0xff] }
0x137e   :  { %2690 = vrcp.f32 %v1329_v36  ;;  %v1555_v36 = vld [vmem:[%s3382_s2 + $0x10] sm:$0xff] }
0x138b   :  { %v2691_v37 = vpop.eup %2690 }
0x138c   :  { %v1343_v43 = vsub.f32 1.0, %v2691_v37  ;;  %v1349_v45 = vmul.f32 %v2691_v37, %v1249_v26 }
0x13dc   :  { %v1334_v38 = vpop.permute.xlu0 %1333 }
0x13dd   :  { %v1336_v39 = vmul.f32 %v2691_v37, %v1334_v38 }
0x13df   :  { %1338 = vrot.lane.b32.xlu1 %v1336_v39, %s2734_s24 }
0x1451   :  { %v1339_v40 = vpop.permute.xlu1 %1338 }
0x1452   :  { %v1341_v41 = vadd.f32 %v1339_v40, %v3115_v46 }
0x1454   :  { %2692 = vtanh.f32 %v1341_v41 }
0x1461   :  { %v2693_v42 = vpop.eup %2692 }
0x1462   :  { %1345 = vrot.lane.b32.xlu0 %v2693_v42, %s2735_s27 }
0x14d4   :  { %v1346_v44 = vpop.permute.xlu0 %1345 }
0x14d5   :  { %v1348_v47 = vmul.f32 %v1346_v44, %v1343_v43 }
0x14d7   :  { %v1350_v48 = vadd.f32 %v1349_v45, %v1348_v47 }
0x14d9   :  { %1352 = vrot.lane.b32.xlu1 %v1350_v48, %s2735_s27 }
0x154b   :  { %v1353_v50 = vpop.permute.xlu1 %1352 }
0x154c   :  { %2541 = vmatmul.mubr.msk.f32.vlgmr.msra.gmra.mxu0 %vm227_vm2, %v1353_v50 }
0x154d   :  { %2556 = vmatprep.mubr.msk.f32.mxu0 %vm2733_vm1, %v2732_v5  ;;  %2555 = vmatpush3.msra.mxu0 %v1556_v0 }
0x154e   :  { %2576 = vmatprep.subr.mxu0 %v2732_v5 }
0x1550   :  { %2557 = vmatmul.mubr.msk.f32.vlgmr.msra.gmra.mxu0 %vm86_vm0, %v1553_v2 }
0x1551   :  { %2577 = vmatpush3.msra.mxu0 %v1656_v4  ;;  %2559 = vmatprep.mubr.msk.f32.mxu0 %vm2733_vm1, %v2732_v5 }
0x1552   :  { %2578 = vmatprep.subr.mxu0 %v2732_v5 }
0x1553   :  { %2579 = vmatpush3.msra.mxu0 %v1655_v22 }
0x1554   :  { %2580 = vmatprep.subr.mxu0 %v2732_v5  ;;  %2560 = vmatmul.mubr.msk.f32.gmra.mxu0 %vm86_vm0, %v1554_v35 }
0x1555   :  { %2581 = vmatpush3.msra.mxu0 %v1654_v8  ;;  %2562 = vmatprep.mubr.msk.f32.mxu0 %vm2733_vm1, %v2732_v5 }
0x1556   :  { %2582 = vmatprep.subr.mxu0 %v2732_v5 }
0x1557   :  { %2583 = vmatpush3.msra.mxu0 %v1653_v10 }
0x1558   :  { %2598 = vmatprep.subr.mxu0 %v2732_v5  ;;  %2563 = vmatmul.mubr.msk.f32.gmra.mxu0 %vm86_vm0, %v1555_v36 }
0x1559   :  { %2584 = vmatprep.mubr.msk.f32.mxu0 %vm2733_vm1, %v2732_v5 }
0x160c   :  { %v1422_v52 = vpop.f32.mrf.mxu0 }
0x160d   :  { %v1423_v46 = vadd.f32 %v3122_v51, %v1422_v52 }
0x160e   :  { %v2542_v53 = vpop.f32.mrf.mxu0 }
0x160f   :  { %1434 = vrot.lane.b32.xlu0 %v1423_v46, %s2734_s24  ;;  %v1426_v54 = vadd.f32 %v1423_v46, %v3124_v16 }
0x1610   :  { %v1639_v17 = vpop.f32.mrf.mxu0 }
0x1611   :  { %v2273_v55 = vmul.f32 -1.442695, %v1426_v54  ;;  %v1640_v25 = vadd.f32 %v3236_v24, %v1639_v17 }
0x1612   :  { %v2558_v18 = vpop.f32.mrf.mxu0 }
0x1613   :  { %2694 = vpow2.f32 %v2273_v55 }
0x1614   :  { %v1644_v43 = vpop.f32.mrf.mxu0 }
0x1615   :  { %v1645_v53 = vadd.f32 %v3236_v24, %v1644_v43  ;;  %v1968_v43 = vld [vmem:[%s3385_s16 + $0x10] sm:$0xff] }
0x1616   :  { %v2561_v44 = vpop.f32.mrf.mxu0 }
0x1617   :  { %v1967_v44 = vld [vmem:[%s3385_s16 + $0x8] sm:$0xff] }
0x1618   :  { %v3254_v45 = vpop.f32.mrf.mxu0 }
0x1619   :  { %v1650_v35 = vadd.f32 %v3236_v24, %v3254_v45  ;;  %v1966_v45 = vld [vmem:[%s3385_s16] sm:$0xff] }
0x161a   :  { %v2564_v47 = vpop.f32.mrf.mxu0 }
0x161b   :  { %v1965_v47 = vld [vmem:[%s3386_s15 + $0x18] sm:$0xff] }
0x1620   :  { %v2695_v56 = vpop.eup %2694 }
0x1621   :  { %v1430_v57 = vadd.f32 1.0, %v2695_v56 }
0x1623   :  { %2696 = vrcp.f32 %v1430_v57 }
0x1630   :  { %v2697_v58 = vpop.eup %2696 }
0x1631   :  { %v1444_v1 = vsub.f32 1.0, %v2697_v58 }
0x1681   :  { %v1435_v59 = vpop.permute.xlu0 %1434 }
0x1682   :  { %v1437_v60 = vmul.f32 %v2697_v58, %v1435_v59 }
0x1684   :  { %1439 = vrot.lane.b32.xlu1 %v1437_v60, %s2734_s24 }
0x16f6   :  { %v1440_v61 = vpop.permute.xlu1 %1439 }
0x16f7   :  { %v1442_v62 = vadd.f32 %v1440_v61, %v3124_v16  ;;  %v1450_v16 = vmul.f32 %v2697_v58, %v1350_v48 }
0x16f9   :  { %2698 = vtanh.f32 %v1442_v62 }
0x1706   :  { %v2699_v63 = vpop.eup %2698 }
0x1707   :  { %1446 = vrot.lane.b32.xlu0 %v2699_v63, %s2735_s27 }
0x1779   :  { %v1447_v13 = vpop.permute.xlu0 %1446 }
0x177a   :  { %v1449_v15 = vmul.f32 %v1447_v13, %v1444_v1 }
0x177c   :  { %v3197_v7 = vadd.f32 %v1450_v16, %v1449_v15 }
0x177e   :  { %1453 = vrot.lane.b32.xlu1 %v3197_v7, %s2735_s27 }
0x17f0   :  { %v1454_v3 = vpop.permute.xlu1 %1453 }
0x17f1   :  { %2552 = vmatmul.mubr.msk.f32.vlgmr.msra.gmra.mxu1 %vm227_vm2, %v1454_v3 }
0x17f2   :  { %2566 = vmatpush3.msra.mxu1 %v1656_v4  ;;  %2573 = vmatprep.mubr.msk.f32.mxu1 %vm2733_vm1, %v2732_v5 }
0x17f3   :  { %2567 = vmatprep.subr.mxu1 %v2732_v5 }
0x17f4   :  { %2568 = vmatpush3.msra.mxu1 %v1655_v22 }
0x17f5   :  { %2569 = vmatprep.subr.mxu1 %v2732_v5 }
0x17f6   :  { %2570 = vmatpush3.msra.mxu1 %v1654_v8 }
0x17f7   :  { %2571 = vmatprep.subr.mxu1 %v2732_v5 }
0x17f8   :  { %2572 = vmatpush3.msra.mxu1 %v1653_v10 }
0x17f9   :  { %2574 = vmatmul.mubr.f32.vlgmr.msra.gmra.mxu1 %v2732_v5  ;;  %2587 = vmatprep.subr.mxu1 %v2732_v5 }
0x17fa   :  { %2588 = vmatpush3.msra.mxu1 %v1656_v4  ;;  %2595 = vmatprep.mubr.msk.f32.mxu1 %vm2733_vm1, %v2732_v5 }
0x17fb   :  { %2589 = vmatprep.subr.mxu1 %v2732_v5 }
0x17fc   :  { %2590 = vmatpush3.msra.mxu1 %v1655_v22 }
0x17fd   :  { %2591 = vmatprep.subr.mxu1 %v2732_v5 }
0x17fe   :  { %2592 = vmatpush3.msra.mxu1 %v1654_v8 }
0x17ff   :  { %2593 = vmatprep.subr.mxu1 %v2732_v5 }
0x1800   :  { %2594 = vmatpush3.msra.mxu1 %v1653_v10 }
0x1801   :  { %2609 = vmatprep.subr.mxu1 %v2732_v5 }
0x18b1   :  { %v3224_v6 = vpop.f32.mrf.mxu1 }
0x18b2   :  { %v1524_v0 = vadd.f32 %v3122_v51, %v3224_v6  ;;  %v2730_v51 = vld [vmem:[%s3405_s0] ss:$0 sm:$0xff] }
0x18b3   :  { %v2553_v19 = vpop.f32.mrf.mxu1  ;;  %v1005_v3 = vadd.f32 %v2730_v51, %v3162_v28 }
0x18b4   :  { %v1527_v1 = vadd.f32 %v1524_v0, %v3117_v49 }
0x18b6   :  { %v2275_v2 = vmul.f32 -1.442695, %v1527_v1 }
0x18b9   :  { %v1730_v9 = vpop.f32.mrf.mxu1 }
0x18ba   :  { %v1731_v23 = vadd.f32 %v3229_v20, %v1730_v9  ;;  %v2731_v9 = vld [vmem:[%s3406_s26] ss:$0 sm:$0xff] }
0x18bb   :  { %v2575_v11 = vpop.f32.mrf.mxu1 }
0x18bc   :  { %1742 = vrot.lane.b32.xlu0 %v1731_v23, %s2734_s24  ;;  %v1734_v26 = vadd.f32 %v1731_v23, %v1640_v25  ;;  %v213_v23 = vadd.f32 %v2731_v9, %v2929_v14 }
0x18be   :  { %v2281_v12 = vmul.f32 -1.442695, %v1734_v26  ;;  %v1008_v28 = vadd.f32 %v1005_v3, %v213_v23 }
0x18c0   :  { %2700 = vpow2.f32 %v2281_v12  ;;  %v2262_v11 = vmul.f32 -1.442695, %v1008_v28  ;;  %v2289_v28 = vld [vmem:[%s3389_s18] ss:$0 sm:$0xff] }
0x18cd   :  { %v2701_v27 = vpop.eup %2700 }
0x18ce   :  { %v1738_v29 = vadd.f32 1.0, %v2701_v27 }
0x18d0   :  { %2702 = vrcp.f32 %v1738_v29 }
0x18dd   :  { %v2703_v30 = vpop.eup %2702 }
0x18de   :  { %v1752_v38 = vsub.f32 1.0, %v2703_v30  ;;  %v1758_v40 = vmul.f32 0.0, %v2703_v30 }
0x192e   :  { %v1743_v31 = vpop.permute.xlu0 %1742 }
0x192f   :  { %v1745_v32 = vmul.f32 %v2703_v30, %v1743_v31 }
0x1931   :  { %1747 = vrot.lane.b32.xlu1 %v1745_v32, %s2734_s24 }
0x19a3   :  { %v1748_v33 = vpop.permute.xlu1 %1747 }
0x19a4   :  { %v1750_v34 = vadd.f32 %v1748_v33, %v1640_v25 }
0x19a6   :  { %2704 = vtanh.f32 %v1750_v34 }
0x19b3   :  { %v2705_v37 = vpop.eup %2704 }
0x19b4   :  { %1754 = vrot.lane.b32.xlu0 %v2705_v37, %s2735_s27 }
0x1a26   :  { %v1755_v39 = vpop.permute.xlu0 %1754 }
0x1a27   :  { %v1757_v41 = vmul.f32 %v1755_v39, %v1752_v38 }
0x1a29   :  { %v1759_v42 = vadd.f32 %v1758_v40, %v1757_v41 }
0x1a2b   :  { %1761 = vrot.lane.b32.xlu1 %v1759_v42, %s2735_s27 }
0x1a9d   :  { %v1762_v48 = vpop.permute.xlu1 %1761 }
0x1a9e   :  { %2585 = vmatmul.mubr.msk.f32.vlgmr.msra.gmra.mxu0 %vm227_vm2, %v1762_v48 }
0x1a9f   :  { %2606 = vmatprep.mubr.msk.f32.mxu0 %vm2733_vm1, %v2732_v5 }
0x1b5e   :  { %v1831_v50 = vpop.f32.mrf.mxu0 }
0x1b5f   :  { %v1832_v52 = vadd.f32 %v3229_v20, %v1831_v50 }
0x1b60   :  { %v2586_v46 = vpop.f32.mrf.mxu0 }
0x1b61   :  { %1843 = vrot.lane.b32.xlu0 %v1832_v52, %s2734_s24  ;;  %v1835_v54 = vadd.f32 %v1832_v52, %v1645_v53 }
0x1b63   :  { %v2283_v55 = vmul.f32 -1.442695, %v1835_v54 }
0x1b65   :  { %2706 = vpow2.f32 %v2283_v55 }
0x1b72   :  { %v2707_v56 = vpop.eup %2706 }
0x1b73   :  { %v1839_v57 = vadd.f32 1.0, %v2707_v56 }
0x1b75   :  { %2708 = vrcp.f32 %v1839_v57  ;;  %v1964_v57 = vld [vmem:[%s3386_s15 + $0x10] sm:$0xff] }
0x1b82   :  { %v2709_v58 = vpop.eup %2708 }
0x1b83   :  { %v1853_v16 = vsub.f32 1.0, %v2709_v58  ;;  %v1859_v22 = vmul.f32 %v2709_v58, %v1759_v42 }
0x1bd3   :  { %v1844_v59 = vpop.permute.xlu0 %1843 }
0x1bd4   :  { %v1846_v60 = vmul.f32 %v2709_v58, %v1844_v59  ;;  %v1963_v58 = vld [vmem:[%s3386_s15 + $0x8] sm:$0xff] }
0x1bd6   :  { %1848 = vrot.lane.b32.xlu1 %v1846_v60, %s2734_s24 }
0x1c48   :  { %v1849_v61 = vpop.permute.xlu1 %1848 }
0x1c49   :  { %v1851_v62 = vadd.f32 %v1849_v61, %v1645_v53 }
0x1c4b   :  { %2710 = vtanh.f32 %v1851_v62 }
0x1c4c   :  { %2712 = vpow2.f32 %v2275_v2  ;;  %v2123_v2 = vld [vmem:[%s3387_s17 + $0x18] sm:$0xff] }
0x1c58   :  { %v2711_v63 = vpop.eup %2710 }
0x1c59   :  { %1855 = vrot.lane.b32.xlu0 %v2711_v63, %s2735_s27  ;;  %v2713_v13 = vpop.eup %2712 }
0x1c5a   :  { %v1531_v4 = vadd.f32 1.0, %v2713_v13  ;;  %v2122_v13 = vld [vmem:[%s3387_s17 + $0x10] sm:$0xff] }
0x1c5c   :  { %2714 = vrcp.f32 %v1531_v4  ;;  %v2120_v4 = vld [vmem:[%s3387_s17] sm:$0xff] }
0x1c5d   :  { %1535 = vrot.lane.b32.xlu0 %v1524_v0, %s2734_s24  ;;  %2716 = vpow2.f32 %v2262_v11 }
0x1c69   :  { %v2715_v18 = vpop.eup %2714 }
0x1c6a   :  { %v2717_v25 = vpop.eup %2716  ;;  %v1545_v50 = vsub.f32 1.0, %v2715_v18  ;;  %v1551_v53 = vmul.f32 %v2715_v18, %v3197_v7  ;;  %v1962_v7 = vld [vmem:[%s3386_s15] sm:$0xff] }
0x1c6b   :  { %v1012_v12 = vadd.f32 1.0, %v2717_v25 }
0x1c6d   :  { %2718 = vrcp.f32 %v1012_v12  ;;  %v2290_v12 = vld [vmem:[%s3390_s19] ss:$0 sm:$0xff] }
0x1c7a   :  { %v2719_v33 = vpop.eup %2718 }
0x1c7b   :  { %v1026_v60 = vsub.f32 1.0, %v2719_v33  ;;  %v1032_v62 = vmul.f32 %v2719_v33, %v3135_v21  ;;  %v2121_v21 = vld [vmem:[%s3387_s17 + $0x8] sm:$0xff] }
0x1ccb   :  { %v1856_v15 = vpop.permute.xlu0 %1855 }
0x1ccc   :  { %v1858_v8 = vmul.f32 %v1856_v15, %v1853_v16 }
0x1cce   :  { %v3268_v10 = vadd.f32 %v1859_v22, %v1858_v8 }
0x1ccf   :  { %v1536_v17 = vpop.permute.xlu0 %1535 }
0x1cd0   :  { %1862 = vrot.lane.b32.xlu1 %v3268_v10, %s2735_s27  ;;  %v1538_v6 = vmul.f32 %v2715_v18, %v1536_v17 }
0x1cd4   :  { %1016 = vrot.lane.b32.xlu1 %v1005_v3, %s2734_s24 }
0x1cd8   :  { %1540 = vrot.lane.b32.xlu1 %v1538_v6, %s2734_s24 }
0x1d42   :  { %v1863_v19 = vpop.permute.xlu1 %1862 }
0x1d43   :  { %2596 = vmatmul.mubr.msk.f32.vlgmr.msra.gmra.mxu1 %vm227_vm2, %v1863_v19 }
0x1d44   :  { %2617 = vmatprep.mubr.msk.f32.mxu1 %vm2733_vm1, %v2732_v5  ;;  %2610 = vmatpush3.msra.mxu1 %v1965_v47 }
0x1d45   :  { %2611 = vmatprep.subr.mxu1 %v2732_v5 }
0x1d46   :  { %v1017_v26 = vpop.permute.xlu1 %1016  ;;  %2612 = vmatpush3.msra.mxu1 %v1964_v57 }
0x1d47   :  { %v1019_v34 = vmul.f32 %v2719_v33, %v1017_v26  ;;  %2613 = vmatprep.subr.mxu1 %v2732_v5 }
0x1d48   :  { %2614 = vmatpush3.msra.mxu1 %v1963_v58 }
0x1d49   :  { %2615 = vmatprep.subr.mxu1 %v2732_v5 }
0x1d4a   :  { %v1541_v27 = vpop.permute.xlu1 %1540  ;;  %2616 = vmatpush3.msra.mxu1 %v1962_v7 }
0x1d4b   :  { %v1543_v29 = vadd.f32 %v1541_v27, %v3117_v49 }
0x1d4d   :  { %2720 = vtanh.f32 %v1543_v29 }
0x1d5a   :  { %v2721_v14 = vpop.eup %2720 }
0x1e03   :  { %v1932_v30 = vpop.f32.mrf.mxu1 }
0x1e04   :  { %v1933_v31 = vadd.f32 %v3229_v20, %v1932_v30  ;;  %v1969_v20 = vld [vmem:[%s3385_s16 + $0x18] sm:$0xff] }
0x1e05   :  { %v2597_v32 = vpop.f32.mrf.mxu1  ;;  %2599 = vmatpush3.msra.mxu0 %v1969_v20 }
0x1e06   :  { %1944 = vrot.lane.b32.xlu0 %v1933_v31, %s2734_s24  ;;  %v1936_v36 = vadd.f32 %v1933_v31, %v1650_v35  ;;  %2600 = vmatprep.subr.mxu0 %v2732_v5  ;;  %v2736_v31 = vmov 0  }
0x1e07   :  { %2601 = vmatpush3.msra.mxu0 %v1968_v43  ;;  %2638 = vset.pattern.permute.xlu1 %v2736_v31 }
0x1e08   :  { %v2285_v37 = vmul.f32 -1.442695, %v1936_v36  ;;  %2602 = vmatprep.subr.mxu0 %v2732_v5  ;;  %2639 = vset.pattern.permute.xlu0 %v2736_v31 }
0x1e09   :  { %2603 = vmatpush3.msra.mxu0 %v1967_v44 }
0x1e0a   :  { %1021 = vrot.lane.b32.xlu0 %v1019_v34, %s2734_s24  ;;  %2722 = vpow2.f32 %v2285_v37  ;;  %2604 = vmatprep.subr.mxu0 %v2732_v5 }
0x1e0b   :  { %2605 = vmatpush3.msra.mxu0 %v1966_v45 }
0x1e0c   :  { %2620 = vmatprep.subr.mxu0 %v2732_v5 }
0x1e0e   :  { %1547 = vrot.lane.b32.xlu0 %v2721_v14, %s2735_s27 }
0x1e17   :  { %v2723_v49 = vpop.eup %2722 }
0x1e18   :  { %v1940_v38 = vadd.f32 1.0, %v2723_v49 }
0x1e1a   :  { %2724 = vrcp.f32 %v1940_v38 }
0x1e27   :  { %v3296_v39 = vpop.eup %2724 }
0x1e28   :  { %v1954_v16 = vsub.f32 1.0, %v3296_v39  ;;  %v1960_v22 = vmul.f32 %v3296_v39, %v3268_v10 }
0x1e78   :  { %v1945_v40 = vpop.permute.xlu0 %1944 }
0x1e79   :  { %v1947_v41 = vmul.f32 %v3296_v39, %v1945_v40 }
0x1e7b   :  { %1949 = vrot.lane.b32.xlu1 %v1947_v41, %s2734_s24 }
0x1e7c   :  { %v1022_v24 = vpop.permute.xlu0 %1021 }
0x1e7d   :  { %v1024_v42 = vadd.f32 %v1022_v24, %v213_v23 }
0x1e7f   :  { %2726 = vtanh.f32 %v1024_v42 }
0x1e80   :  { %v1548_v48 = vpop.permute.xlu0 %1547 }
0x1e81   :  { %v1550_v52 = vmul.f32 %v1548_v48, %v1545_v50 }
0x1e83   :  { %v1552_v54 = vadd.f32 %v1551_v53, %v1550_v52 }
0x1e8c   :  { %v2727_v46 = vpop.eup %2726 }
0x1e8d   :  { %1028 = vrot.lane.b32.xlu1 %v2727_v46, %s2735_s27 }
0x1e91   :  { %1971 = vrot.lane.b32.xlu1 %v1552_v54, %s2735_s27 }
0x1eed   :  { %v1950_v55 = vpop.permute.xlu1 %1949 }
0x1eee   :  { %v1952_v56 = vadd.f32 %v1950_v55, %v1650_v35 }
0x1ef0   :  { %2728 = vtanh.f32 %v1952_v56 }
0x1efd   :  { %v2729_v59 = vpop.eup %2728 }
0x1efe   :  { %1956 = vrot.lane.b32.xlu0 %v2729_v59, %s2735_s27 }
0x1eff   :  { %v1029_v61 = vpop.permute.xlu1 %1028 }
0x1f00   :  { %v1031_v63 = vmul.f32 %v1029_v61, %v1026_v60 }
0x1f02   :  { %v1033_v0 = vadd.f32 %v1032_v62, %v1031_v63 }
0x1f03   :  { %v1972_v1 = vpop.permute.xlu1 %1971 }
0x1f04   :  { %2046 = vrot.lane.b32.xlu0 %v1033_v0, %s2735_s27  ;;  %2607 = vmatmul.mubr.msk.f32.vlgmr.msra.gmra.mxu0 %vm227_vm2, %v1972_v1 }
0x1f05   :  { %2628 = vmatprep.mubr.msk.f32.mxu0 %vm2733_vm1, %v2732_v5  ;;  %2621 = vmatpush3.msra.mxu0 %v2123_v2 }
0x1f06   :  { %2622 = vmatprep.subr.mxu0 %v2732_v5 }
0x1f07   :  { %2623 = vmatpush3.msra.mxu0 %v2122_v13 }
0x1f08   :  { %2624 = vmatprep.subr.mxu0 %v2732_v5 }
0x1f09   :  { %2625 = vmatpush3.msra.mxu0 %v2121_v21 }
0x1f0a   :  { %2626 = vmatprep.subr.mxu0 %v2732_v5  ;;  %v26_v5 = vstv %s3388_s20 }
0x1f0b   :  { %2627 = vmatpush3.msra.mxu0 %v2120_v4  ;;  %27 = vst [vmem:[#allocation2] sm:$0x1] %v26_v5 }
0x1f12   :  { %v2291_v32 = vld [vmem:[#allocation2] ss:$0 sm:$0xff] }
0x1f70   :  { %v1957_v15 = vpop.permute.xlu0 %1956 }
0x1f71   :  { %v1959_v8 = vmul.f32 %v1957_v15, %v1954_v16 }
0x1f73   :  { %v1961_v51 = vadd.f32 %v1960_v22, %v1959_v8 }
0x1f75   :  { %2125 = vrot.lane.b32.xlu1 %v1961_v51, %s2735_s27 }
0x1f76   :  { %v2047_v3 = vpop.permute.xlu0 %2046 }
0x1f77   :  { %2618 = vmatmul.mubr.msk.f32.vlgmr.msra.gmra.mxu1 %vm227_vm2, %v2047_v3 }
0x1fc4   :  { %v2041_v17 = vpop.f32.mrf.mxu0 }
0x1fc6   :  { %v2608_v18 = vpop.f32.mrf.mxu0 }
0x1fe7   :  { %v2126_v6 = vpop.permute.xlu1 %2125 }
0x1fe8   :  { %2629 = vmatmul.mubr.msk.f32.vlgmr.msra.gmra.mxu0 %vm227_vm2, %v2126_v6 }
0x2037   :  { %v2116_v19 = vpop.f32.mrf.mxu1 }
0x2038   :  { %v2117_v10 = vadd.f32 %v2116_v19, %v2041_v17 }
0x2039   :  { %v2619_v9 = vpop.f32.mrf.mxu1 }
0x20a8   :  { %v2195_v23 = vpop.f32.mrf.mxu0 }
0x20a9   :  { %v2199_v11 = vadd.f32 %v2195_v23, %v2117_v10 }
0x20aa   :  { %v2630_v25 = vpop.f32.mrf.mxu0 }
0x20ab   :  { %v2207_v26 = vadd.f32 %v2289_v28, %v2199_v11 }
0x20ad   :  { %v2208_v27 = vmax.f32 %v2207_v26, 0.0 }
0x20af   :  { %v2216_v29 = vmul.f32 %v2290_v12, %v2208_v27 }
0x20b1   :  { %v2217_v30 = vsel %vm227_vm2, %v2216_v29, 0.0 }
0x20b2   :  { %2218 = vadd.xlane.f32.xlu0 %v2217_v30 }
0x213b   :  { %v2219_v33 = vpop.xlane.xlu0 %2218 }
0x213c   :  { %v2227_v34 = vadd.f32 %v2291_v32, %v2219_v33 }
0x213e   :  { %2230 = vperm.xlu1 %2638, %v2227_v34  }
0x21b9   :  { %v2231_v14 = vpop.permute.xlu1 %2230 }
0x21ba   :  { %2233 = vst [vmem:[%s3391_s21] sm:$0xff] %v2231_v14 }

</bundles_post_ra>
